<compile_context>
chip_gen: v6e
topology: v6e:2x2x1
jax: 0.10.0
libtpu: 0.0.40
codegen_flags: <defaults>
</compile_context>

<pallas_src>
import functools

import jax
import jax.numpy as jnp
import numpy as np
from jax import lax
from jax.experimental import pallas as pl
from jax.experimental.pallas import tpu as pltpu


def drqn_lstm_kernel(x_ref, h0_ref, c0_ref,
                     w1_ref, b1_ref,
                     wih_ref, bx_ref, whh_ref,
                     w2_ref, b2_ref,
                     y_ref, h_out_ref, c_out_ref,
                     gx_scr, hseq_scr):
    T, Bp, Hp = hseq_scr.shape

    # ---- Phase 1: batched, time-independent GEMMs (l1 + ReLU, LSTM input
    # projection), hoisted off the serial critical path.
    a = jnp.maximum(
        jnp.dot(x_ref[...], w1_ref[...], preferred_element_type=jnp.float32)
        + b1_ref[...], 0.0)                                     # (T*Bp, Hp)
    gx = (jnp.dot(a, wih_ref[...], preferred_element_type=jnp.float32)
          + bx_ref[...])                                        # (T*Bp, 4Hp)
    gx_scr[...] = gx.reshape(T, Bp, 4 * Hp)

    whh = whh_ref[...]                                          # hoisted load

    # ---- Phase 2: serial recurrence.  Only h_prev @ w_hh + elementwise
    # gates.  h/c are loop carries (registers); per-step h goes to VMEM.
    def step(t, carry):
        h_prev, c_prev = carry
        gates = gx_scr[t] + jnp.dot(h_prev, whh,
                                    preferred_element_type=jnp.float32)
        # gate layout (prepared in the wrapper): [i, f, o, g]
        sig = jax.nn.sigmoid(gates[:, :3 * Hp])                 # one EUP slab
        i_g = sig[:, 0:Hp]
        f_g = sig[:, Hp:2 * Hp]
        o_g = sig[:, 2 * Hp:3 * Hp]
        g_g = jnp.tanh(gates[:, 3 * Hp:])
        c_new = f_g * c_prev + i_g * g_g
        h_new = o_g * jnp.tanh(c_new)
        hseq_scr[t] = h_new
        return h_new, c_new

    h_fin, c_fin = lax.fori_loop(0, T, step,
                                 (h0_ref[...], c0_ref[...]),
                                 unroll=True)

    # ---- Phase 3: batched output head (lane-dense: Ap is a multiple of 128).
    h_all = hseq_scr[...].reshape(T * Bp, Hp)
    y_ref[...] = (jnp.dot(h_all, w2_ref[...],
                          preferred_element_type=jnp.float32)
                  + b2_ref[...])                                # (T*Bp, Ap)

    # Final-state outputs, written exactly once.
    h_out_ref[...] = h_fin
    c_out_ref[...] = c_fin


def _round_up(n, m):
    return ((n + m - 1) // m) * m


@functools.partial(jax.jit, static_argnames=())
def drqn_lstm_forward(x, h, c, params):
    """x: (B, T, n_states); h, c: (1, B, H). Returns (y, h_n, c_n)."""
    B, T, S = x.shape
    H = params['w1'].shape[1]
    A = params['w2'].shape[1]
    f32 = jnp.float32

    # Pad to TPU-native tiles: batch -> multiple of 8 sublanes,
    # hidden / action dims -> multiples of 128 lanes.
    Bp = _round_up(max(B, 8), 8)
    Hp = _round_up(max(H, 128), 128)
    Ap = _round_up(max(A, 128), 128)

    def pad_to(arr, shape):
        return jnp.pad(arr, [(0, s - d) for d, s in zip(arr.shape, shape)])

    # Gate reorder: PyTorch (i, f, g, o) -> kernel (i, f, o, g); each gate
    # block is padded H -> Hp independently (zero padding is exact).
    def pack_gate_mat(w):                       # (H, 4H) -> (Hp, 4Hp)
        gi, gf, gg, go = jnp.split(w, 4, axis=1)
        return jnp.concatenate(
            [pad_to(g, (Hp, Hp)) for g in (gi, gf, go, gg)], axis=1)

    def pack_gate_vec(b):                       # (1, 4H) -> (1, 4Hp)
        gi, gf, gg, go = jnp.split(b, 4, axis=1)
        return jnp.concatenate(
            [pad_to(g, (1, Hp)) for g in (gi, gf, go, gg)], axis=1)

    w1p = pad_to(params['w1'].astype(f32), (S, Hp))
    b1p = pad_to(params['b1'].astype(f32), (1, Hp))
    wihp = pack_gate_mat(params['w_ih'].astype(f32))
    whhp = pack_gate_mat(params['w_hh'].astype(f32))
    bxp = pack_gate_vec((params['b_ih'] + params['b_hh']).astype(f32))
    w2p = pad_to(params['w2'].astype(f32), (Hp, Ap))
    b2p = pad_to(params['b2'].astype(f32), (1, Ap))

    # Inputs: time-major, batch-padded, time*batch flattened for the GEMMs.
    x_tm = jnp.transpose(x, (1, 0, 2)).astype(f32)              # (T, B, S)
    x_p = pad_to(x_tm, (T, Bp, S)).reshape(T * Bp, S)
    h0p = pad_to(h[0].astype(f32), (Bp, Hp))
    c0p = pad_to(c[0].astype(f32), (Bp, Hp))

    grid_spec = pltpu.PrefetchScalarGridSpec(
        num_scalar_prefetch=0,
        grid=(1,),                               # single invocation, loop inside
        in_specs=[
            pl.BlockSpec((T * Bp, S), lambda i: (0, 0)),        # x (flattened)
            pl.BlockSpec((Bp, Hp), lambda i: (0, 0)),           # h0
            pl.BlockSpec((Bp, Hp), lambda i: (0, 0)),           # c0
            pl.BlockSpec((S, Hp), lambda i: (0, 0)),            # w1
            pl.BlockSpec((1, Hp), lambda i: (0, 0)),            # b1
            pl.BlockSpec((Hp, 4 * Hp), lambda i: (0, 0)),       # w_ih (packed)
            pl.BlockSpec((1, 4 * Hp), lambda i: (0, 0)),        # b_ih+b_hh
            pl.BlockSpec((Hp, 4 * Hp), lambda i: (0, 0)),       # w_hh (packed)
            pl.BlockSpec((Hp, Ap), lambda i: (0, 0)),           # w2
            pl.BlockSpec((1, Ap), lambda i: (0, 0)),            # b2
        ],
        out_specs=[
            pl.BlockSpec((T * Bp, Ap), lambda i: (0, 0)),       # y (flattened)
            pl.BlockSpec((Bp, Hp), lambda i: (0, 0)),           # h_n
            pl.BlockSpec((Bp, Hp), lambda i: (0, 0)),           # c_n
        ],
        scratch_shapes=[pltpu.VMEM((T, Bp, 4 * Hp), f32),       # gates_x
                        pltpu.VMEM((T, Bp, Hp), f32)],          # per-step h
    )

    y_flat, h_n, c_n = pl.pallas_call(
        drqn_lstm_kernel,
        out_shape=(jax.ShapeDtypeStruct((T * Bp, Ap), f32),
                   jax.ShapeDtypeStruct((Bp, Hp), f32),
                   jax.ShapeDtypeStruct((Bp, Hp), f32)),
        grid_spec=grid_spec,
        compiler_params=pltpu.CompilerParams(
            dimension_semantics=("arbitrary",),    # serial state carry
            vmem_limit_bytes=64 << 20),
    )(x_p, h0p, c0p, w1p, b1p, wihp, bxp, whhp, w2p, b2p)

    # Un-pad / restore batch_first layout.
    y = y_flat.reshape(T, Bp, Ap)[:, :B, :A]
    y = jnp.transpose(y, (1, 0, 2))                             # (B, T, A)
    return y, h_n[:B, :H][None], c_n[:B, :H][None]


def init_params(key, n_states, n_actions, hidden_dim):
    """Deterministic PyTorch-style uniform init (weights stored transposed,
    LSTM gate order i, f, g, o as in torch.nn.LSTM)."""
    ks = jax.random.split(key, 8)

    def u(k, shape, bound):
        return jax.random.uniform(k, shape, jnp.float32, -bound, bound)

    b_l1 = 1.0 / np.sqrt(n_states)
    b_lstm = 1.0 / np.sqrt(hidden_dim)
    b_l2 = 1.0 / np.sqrt(hidden_dim)
    return {
        'w1':   u(ks[0], (n_states, hidden_dim), b_l1),
        'b1':   u(ks[1], (1, hidden_dim), b_l1),
        'w_ih': u(ks[2], (hidden_dim, 4 * hidden_dim), b_lstm),
        'b_ih': u(ks[3], (1, 4 * hidden_dim), b_lstm),
        'w_hh': u(ks[4], (hidden_dim, 4 * hidden_dim), b_lstm),
        'b_hh': u(ks[5], (1, 4 * hidden_dim), b_lstm),
        'w2':   u(ks[6], (hidden_dim, n_actions), b_l2),
        'b2':   u(ks[7], (1, n_actions), b_l2),
    }


def reference_forward(x, h, c, p):
    """Pure-JAX reference matching torch (Linear -> ReLU -> LSTM -> Linear)."""
    B, T, S = x.shape
    H = p['w1'].shape[1]
    a = jax.nn.relu(x @ p['w1'] + p['b1'][0])        # (B, T, H)
    h_t, c_t = h[0], c[0]
    ys = []
    for t in range(T):
        gates = (a[:, t] @ p['w_ih'] + p['b_ih'][0]
                 + h_t @ p['w_hh'] + p['b_hh'][0])
        i = jax.nn.sigmoid(gates[:, :H])
        f = jax.nn.sigmoid(gates[:, H:2 * H])
        g = jnp.tanh(gates[:, 2 * H:3 * H])
        o = jax.nn.sigmoid(gates[:, 3 * H:])
        c_t = f * c_t + i * g
        h_t = o * jnp.tanh(c_t)
        ys.append(h_t @ p['w2'] + p['b2'][0])
    return jnp.stack(ys, axis=1), h_t[None], c_t[None]


if __name__ == "__main__":
    B, T = 2, 8
    n_states, n_actions, hidden_dim = 4, 2, 64

    key = jax.random.PRNGKey(0)
    k_x, k_p = jax.random.split(key)

    params = init_params(k_p, n_states, n_actions, hidden_dim)
    x = jax.random.normal(k_x, (B, T, n_states), jnp.float32)
    h0 = jnp.zeros((1, B, hidden_dim), jnp.float32)
    c0 = jnp.zeros((1, B, hidden_dim), jnp.float32)

    y, h_n, c_n = drqn_lstm_forward(x, h0, c0, params)
    jax.block_until_ready((y, h_n, c_n))

    y_ref, h_ref, c_ref = reference_forward(x, h0, c0, params)
    assert np.allclose(np.asarray(y), np.asarray(y_ref), atol=1e-4, rtol=1e-4)
    assert np.allclose(np.asarray(h_n), np.asarray(h_ref), atol=1e-4, rtol=1e-4)
    assert np.allclose(np.asarray(c_n), np.asarray(c_ref), atol=1e-4, rtol=1e-4)

    print("KERNEL_OK")
</pallas_src>

<mosaic_0001>
module attributes {stable_mosaic.version = 11 : i64} {
  func.func @drqn_lstm_kernel(%arg0: i32, %arg1: memref<64x4xf32, #tpu.memory_space<vmem>>, %arg2: memref<8x128xf32, #tpu.memory_space<vmem>>, %arg3: memref<8x128xf32, #tpu.memory_space<vmem>>, %arg4: memref<4x128xf32, #tpu.memory_space<vmem>>, %arg5: memref<1x128xf32, #tpu.memory_space<vmem>>, %arg6: memref<128x512xf32, #tpu.memory_space<vmem>>, %arg7: memref<1x512xf32, #tpu.memory_space<vmem>>, %arg8: memref<128x512xf32, #tpu.memory_space<vmem>>, %arg9: memref<128x128xf32, #tpu.memory_space<vmem>>, %arg10: memref<1x128xf32, #tpu.memory_space<vmem>>, %arg11: memref<64x128xf32, #tpu.memory_space<vmem>>, %arg12: memref<8x128xf32, #tpu.memory_space<vmem>>, %arg13: memref<8x128xf32, #tpu.memory_space<vmem>>, %arg14: memref<8x8x512xf32, #tpu.memory_space<vmem>>, %arg15: memref<8x8x128xf32, #tpu.memory_space<vmem>>) attributes {dimension_semantics = [#tpu.dimension_semantics<arbitrary>], iteration_bounds = array<i64: 1>, scalar_prefetch = 0 : i64, scratch_operands = 2 : i64, tpu.core_type = #tpu.core_type<tc>, window_params = [{pipeline_mode = #tpu.pipeline_mode<synchronous>, transform_indices = @transform_0, window_bounds = array<i64: 64, 4>}, {pipeline_mode = #tpu.pipeline_mode<synchronous>, transform_indices = @transform_1, window_bounds = array<i64: 8, 128>}, {pipeline_mode = #tpu.pipeline_mode<synchronous>, transform_indices = @transform_2, window_bounds = array<i64: 8, 128>}, {pipeline_mode = #tpu.pipeline_mode<synchronous>, transform_indices = @transform_3, window_bounds = array<i64: 4, 128>}, {pipeline_mode = #tpu.pipeline_mode<synchronous>, transform_indices = @transform_4, window_bounds = array<i64: 1, 128>}, {pipeline_mode = #tpu.pipeline_mode<synchronous>, transform_indices = @transform_5, window_bounds = array<i64: 128, 512>}, {pipeline_mode = #tpu.pipeline_mode<synchronous>, transform_indices = @transform_6, window_bounds = array<i64: 1, 512>}, {pipeline_mode = #tpu.pipeline_mode<synchronous>, transform_indices = @transform_7, window_bounds = array<i64: 128, 512>}, {pipeline_mode = #tpu.pipeline_mode<synchronous>, transform_indices = @transform_8, window_bounds = array<i64: 128, 128>}, {pipeline_mode = #tpu.pipeline_mode<synchronous>, transform_indices = @transform_9, window_bounds = array<i64: 1, 128>}, {pipeline_mode = #tpu.pipeline_mode<synchronous>, transform_indices = @transform_10, window_bounds = array<i64: 64, 128>}, {pipeline_mode = #tpu.pipeline_mode<synchronous>, transform_indices = @transform_11, window_bounds = array<i64: 8, 128>}, {pipeline_mode = #tpu.pipeline_mode<synchronous>, transform_indices = @transform_12, window_bounds = array<i64: 8, 128>}]} {
    %c0 = arith.constant 0 : index
    %c0_0 = arith.constant 0 : index
    %0 = vector.load %arg1[%c0, %c0_0] : memref<64x4xf32, #tpu.memory_space<vmem>>, vector<64x4xf32>
    %c0_1 = arith.constant 0 : index
    %c0_2 = arith.constant 0 : index
    %1 = vector.load %arg4[%c0_1, %c0_2] : memref<4x128xf32, #tpu.memory_space<vmem>>, vector<4x128xf32>
    %cst = arith.constant dense<0.000000e+00> : vector<64x128xf32>
    %2 = tpu.matmul %0, %1, %cst {dimension_numbers = #tpu.dot_dimension_numbers<[1], [0], [0], [1], [0, 0, 1, 1], [], []>} : vector<64x4xf32>, vector<4x128xf32>, vector<64x128xf32> -> vector<64x128xf32>
    %c0_3 = arith.constant 0 : index
    %c0_4 = arith.constant 0 : index
    %3 = vector.load %arg5[%c0_3, %c0_4] : memref<1x128xf32, #tpu.memory_space<vmem>>, vector<1x128xf32>
    %4 = vector.broadcast %3 : vector<1x128xf32> to vector<64x128xf32>
    %5 = arith.addf %2, %4 : vector<64x128xf32>
    %cst_5 = arith.constant 0.000000e+00 : f32
    %6 = vector.broadcast %cst_5 : f32 to vector<64x128xf32>
    %7 = arith.maximumf %5, %6 : vector<64x128xf32>
    %c0_6 = arith.constant 0 : index
    %c0_7 = arith.constant 0 : index
    %8 = vector.load %arg6[%c0_6, %c0_7] : memref<128x512xf32, #tpu.memory_space<vmem>>, vector<128x512xf32>
    %cst_8 = arith.constant dense<0.000000e+00> : vector<64x512xf32>
    %9 = tpu.matmul %7, %8, %cst_8 {dimension_numbers = #tpu.dot_dimension_numbers<[1], [0], [0], [1], [0, 0, 1, 1], [], []>} : vector<64x128xf32>, vector<128x512xf32>, vector<64x512xf32> -> vector<64x512xf32>
    %c0_9 = arith.constant 0 : index
    %c0_10 = arith.constant 0 : index
    %10 = vector.load %arg7[%c0_9, %c0_10] : memref<1x512xf32, #tpu.memory_space<vmem>>, vector<1x512xf32>
    %11 = vector.broadcast %10 : vector<1x512xf32> to vector<64x512xf32>
    %12 = arith.addf %9, %11 : vector<64x512xf32>
    %13 = vector.shape_cast %12 : vector<64x512xf32> to vector<8x8x512xf32>
    %c0_11 = arith.constant 0 : index
    %c0_12 = arith.constant 0 : index
    %c0_13 = arith.constant 0 : index
    %14 = vector.load %arg14[%c0_11, %c0_12, %c0_13] : memref<8x8x512xf32, #tpu.memory_space<vmem>>, vector<8x8x512xf32>
    tpu.vector_store %arg14[%c0_11, %c0_12, %c0_13], %13 {strides = array<i32>} : memref<8x8x512xf32, #tpu.memory_space<vmem>>, vector<8x8x512xf32>,
    %c0_14 = arith.constant 0 : index
    %c0_15 = arith.constant 0 : index
    %15 = vector.load %arg8[%c0_14, %c0_15] : memref<128x512xf32, #tpu.memory_space<vmem>>, vector<128x512xf32>
    %c0_16 = arith.constant 0 : index
    %c0_17 = arith.constant 0 : index
    %16 = vector.load %arg2[%c0_16, %c0_17] : memref<8x128xf32, #tpu.memory_space<vmem>>, vector<8x128xf32>
    %c0_18 = arith.constant 0 : index
    %c0_19 = arith.constant 0 : index
    %17 = vector.load %arg3[%c0_18, %c0_19] : memref<8x128xf32, #tpu.memory_space<vmem>>, vector<8x128xf32>
    %c0_i32 = arith.constant 0 : i32
    %18 = arith.index_cast %c0_i32 : i32 to index
    %c0_20 = arith.constant 0 : index
    %c0_21 = arith.constant 0 : index
    %19 = vector.load %arg14[%18, %c0_20, %c0_21] : memref<8x8x512xf32, #tpu.memory_space<vmem>>, vector<1x8x512xf32>
    %20 = vector.shape_cast %19 : vector<1x8x512xf32> to vector<8x512xf32>
    %cst_22 = arith.constant dense<0.000000e+00> : vector<8x512xf32>
    %21 = tpu.matmul %16, %15, %cst_22 {dimension_numbers = #tpu.dot_dimension_numbers<[1], [0], [0], [1], [0, 0, 1, 1], [], []>} : vector<8x128xf32>, vector<128x512xf32>, vector<8x512xf32> -> vector<8x512xf32>
    %22 = arith.addf %20, %21 : vector<8x512xf32>
    %23 = vector.extract_strided_slice %22 {offsets = [0, 0], sizes = [8, 384], strides = [1, 1]} : vector<8x512xf32> to vector<8x384xf32>
    %24 = arith.negf %23 : vector<8x384xf32>
    %25 = math.exp %24 : vector<8x384xf32>
    %cst_23 = arith.constant 1.000000e+00 : f32
    %26 = vector.broadcast %cst_23 : f32 to vector<8x384xf32>
    %27 = arith.addf %26, %25 : vector<8x384xf32>
    %28 = arith.divf %26, %27 : vector<8x384xf32>
    %29 = vector.extract_strided_slice %28 {offsets = [0, 0], sizes = [8, 128], strides = [1, 1]} : vector<8x384xf32> to vector<8x128xf32>
    %30 = vector.extract_strided_slice %28 {offsets = [0, 128], sizes = [8, 128], strides = [1, 1]} : vector<8x384xf32> to vector<8x128xf32>
    %31 = vector.extract_strided_slice %28 {offsets = [0, 256], sizes = [8, 128], strides = [1, 1]} : vector<8x384xf32> to vector<8x128xf32>
    %32 = vector.extract_strided_slice %22 {offsets = [0, 384], sizes = [8, 128], strides = [1, 1]} : vector<8x512xf32> to vector<8x128xf32>
    %33 = math.tanh %32 : vector<8x128xf32>
    %34 = arith.mulf %30, %17 : vector<8x128xf32>
    %35 = arith.mulf %29, %33 : vector<8x128xf32>
    %36 = arith.addf %34, %35 : vector<8x128xf32>
    %37 = math.tanh %36 : vector<8x128xf32>
    %38 = arith.mulf %31, %37 : vector<8x128xf32>
    %39 = arith.index_cast %c0_i32 : i32 to index
    %c0_24 = arith.constant 0 : index
    %c0_25 = arith.constant 0 : index
    %40 = vector.load %arg15[%39, %c0_24, %c0_25] : memref<8x8x128xf32, #tpu.memory_space<vmem>>, vector<1x8x128xf32>
    %41 = vector.shape_cast %40 : vector<1x8x128xf32> to vector<8x128xf32>
    %42 = vector.shape_cast %38 : vector<8x128xf32> to vector<1x8x128xf32>
    tpu.vector_store %arg15[%39, %c0_24, %c0_25], %42 {strides = array<i32>} : memref<8x8x128xf32, #tpu.memory_space<vmem>>, vector<1x8x128xf32>,
    %c1_i32 = arith.constant 1 : i32
    %43 = arith.index_cast %c1_i32 : i32 to index
    %c0_26 = arith.constant 0 : index
    %c0_27 = arith.constant 0 : index
    %44 = vector.load %arg14[%43, %c0_26, %c0_27] : memref<8x8x512xf32, #tpu.memory_space<vmem>>, vector<1x8x512xf32>
    %45 = vector.shape_cast %44 : vector<1x8x512xf32> to vector<8x512xf32>
    %cst_28 = arith.constant dense<0.000000e+00> : vector<8x512xf32>
    %46 = tpu.matmul %38, %15, %cst_28 {dimension_numbers = #tpu.dot_dimension_numbers<[1], [0], [0], [1], [0, 0, 1, 1], [], []>} : vector<8x128xf32>, vector<128x512xf32>, vector<8x512xf32> -> vector<8x512xf32>
    %47 = arith.addf %45, %46 : vector<8x512xf32>
    %48 = vector.extract_strided_slice %47 {offsets = [0, 0], sizes = [8, 384], strides = [1, 1]} : vector<8x512xf32> to vector<8x384xf32>
    %49 = arith.negf %48 : vector<8x384xf32>
    %50 = math.exp %49 : vector<8x384xf32>
    %cst_29 = arith.constant 1.000000e+00 : f32
    %51 = vector.broadcast %cst_29 : f32 to vector<8x384xf32>
    %52 = arith.addf %51, %50 : vector<8x384xf32>
    %53 = arith.divf %51, %52 : vector<8x384xf32>
    %54 = vector.extract_strided_slice %53 {offsets = [0, 0], sizes = [8, 128], strides = [1, 1]} : vector<8x384xf32> to vector<8x128xf32>
    %55 = vector.extract_strided_slice %53 {offsets = [0, 128], sizes = [8, 128], strides = [1, 1]} : vector<8x384xf32> to vector<8x128xf32>
    %56 = vector.extract_strided_slice %53 {offsets = [0, 256], sizes = [8, 128], strides = [1, 1]} : vector<8x384xf32> to vector<8x128xf32>
    %57 = vector.extract_strided_slice %47 {offsets = [0, 384], sizes = [8, 128], strides = [1, 1]} : vector<8x512xf32> to vector<8x128xf32>
    %58 = math.tanh %57 : vector<8x128xf32>
    %59 = arith.mulf %55, %36 : vector<8x128xf32>
    %60 = arith.mulf %54, %58 : vector<8x128xf32>
    %61 = arith.addf %59, %60 : vector<8x128xf32>
    %62 = math.tanh %61 : vector<8x128xf32>
    %63 = arith.mulf %56, %62 : vector<8x128xf32>
    %64 = arith.index_cast %c1_i32 : i32 to index
    %c0_30 = arith.constant 0 : index
    %c0_31 = arith.constant 0 : index
    %65 = vector.load %arg15[%64, %c0_30, %c0_31] : memref<8x8x128xf32, #tpu.memory_space<vmem>>, vector<1x8x128xf32>
    %66 = vector.shape_cast %65 : vector<1x8x128xf32> to vector<8x128xf32>
    %67 = vector.shape_cast %63 : vector<8x128xf32> to vector<1x8x128xf32>
    tpu.vector_store %arg15[%64, %c0_30, %c0_31], %67 {strides = array<i32>} : memref<8x8x128xf32, #tpu.memory_space<vmem>>, vector<1x8x128xf32>,
    %c2_i32 = arith.constant 2 : i32
    %68 = arith.index_cast %c2_i32 : i32 to index
    %c0_32 = arith.constant 0 : index
    %c0_33 = arith.constant 0 : index
    %69 = vector.load %arg14[%68, %c0_32, %c0_33] : memref<8x8x512xf32, #tpu.memory_space<vmem>>, vector<1x8x512xf32>
    %70 = vector.shape_cast %69 : vector<1x8x512xf32> to vector<8x512xf32>
    %cst_34 = arith.constant dense<0.000000e+00> : vector<8x512xf32>
    %71 = tpu.matmul %63, %15, %cst_34 {dimension_numbers = #tpu.dot_dimension_numbers<[1], [0], [0], [1], [0, 0, 1, 1], [], []>} : vector<8x128xf32>, vector<128x512xf32>, vector<8x512xf32> -> vector<8x512xf32>
    %72 = arith.addf %70, %71 : vector<8x512xf32>
    %73 = vector.extract_strided_slice %72 {offsets = [0, 0], sizes = [8, 384], strides = [1, 1]} : vector<8x512xf32> to vector<8x384xf32>
    %74 = arith.negf %73 : vector<8x384xf32>
    %75 = math.exp %74 : vector<8x384xf32>
    %cst_35 = arith.constant 1.000000e+00 : f32
    %76 = vector.broadcast %cst_35 : f32 to vector<8x384xf32>
    %77 = arith.addf %76, %75 : vector<8x384xf32>
    %78 = arith.divf %76, %77 : vector<8x384xf32>
    %79 = vector.extract_strided_slice %78 {offsets = [0, 0], sizes = [8, 128], strides = [1, 1]} : vector<8x384xf32> to vector<8x128xf32>
    %80 = vector.extract_strided_slice %78 {offsets = [0, 128], sizes = [8, 128], strides = [1, 1]} : vector<8x384xf32> to vector<8x128xf32>
    %81 = vector.extract_strided_slice %78 {offsets = [0, 256], sizes = [8, 128], strides = [1, 1]} : vector<8x384xf32> to vector<8x128xf32>
    %82 = vector.extract_strided_slice %72 {offsets = [0, 384], sizes = [8, 128], strides = [1, 1]} : vector<8x512xf32> to vector<8x128xf32>
    %83 = math.tanh %82 : vector<8x128xf32>
    %84 = arith.mulf %80, %61 : vector<8x128xf32>
    %85 = arith.mulf %79, %83 : vector<8x128xf32>
    %86 = arith.addf %84, %85 : vector<8x128xf32>
    %87 = math.tanh %86 : vector<8x128xf32>
    %88 = arith.mulf %81, %87 : vector<8x128xf32>
    %89 = arith.index_cast %c2_i32 : i32 to index
    %c0_36 = arith.constant 0 : index
    %c0_37 = arith.constant 0 : index
    %90 = vector.load %arg15[%89, %c0_36, %c0_37] : memref<8x8x128xf32, #tpu.memory_space<vmem>>, vector<1x8x128xf32>
    %91 = vector.shape_cast %90 : vector<1x8x128xf32> to vector<8x128xf32>
    %92 = vector.shape_cast %88 : vector<8x128xf32> to vector<1x8x128xf32>
    tpu.vector_store %arg15[%89, %c0_36, %c0_37], %92 {strides = array<i32>} : memref<8x8x128xf32, #tpu.memory_space<vmem>>, vector<1x8x128xf32>,
    %c3_i32 = arith.constant 3 : i32
    %93 = arith.index_cast %c3_i32 : i32 to index
    %c0_38 = arith.constant 0 : index
    %c0_39 = arith.constant 0 : index
    %94 = vector.load %arg14[%93, %c0_38, %c0_39] : memref<8x8x512xf32, #tpu.memory_space<vmem>>, vector<1x8x512xf32>
    %95 = vector.shape_cast %94 : vector<1x8x512xf32> to vector<8x512xf32>
    %cst_40 = arith.constant dense<0.000000e+00> : vector<8x512xf32>
    %96 = tpu.matmul %88, %15, %cst_40 {dimension_numbers = #tpu.dot_dimension_numbers<[1], [0], [0], [1], [0, 0, 1, 1], [], []>} : vector<8x128xf32>, vector<128x512xf32>, vector<8x512xf32> -> vector<8x512xf32>
    %97 = arith.addf %95, %96 : vector<8x512xf32>
    %98 = vector.extract_strided_slice %97 {offsets = [0, 0], sizes = [8, 384], strides = [1, 1]} : vector<8x512xf32> to vector<8x384xf32>
    %99 = arith.negf %98 : vector<8x384xf32>
    %100 = math.exp %99 : vector<8x384xf32>
    %cst_41 = arith.constant 1.000000e+00 : f32
    %101 = vector.broadcast %cst_41 : f32 to vector<8x384xf32>
    %102 = arith.addf %101, %100 : vector<8x384xf32>
    %103 = arith.divf %101, %102 : vector<8x384xf32>
    %104 = vector.extract_strided_slice %103 {offsets = [0, 0], sizes = [8, 128], strides = [1, 1]} : vector<8x384xf32> to vector<8x128xf32>
    %105 = vector.extract_strided_slice %103 {offsets = [0, 128], sizes = [8, 128], strides = [1, 1]} : vector<8x384xf32> to vector<8x128xf32>
    %106 = vector.extract_strided_slice %103 {offsets = [0, 256], sizes = [8, 128], strides = [1, 1]} : vector<8x384xf32> to vector<8x128xf32>
    %107 = vector.extract_strided_slice %97 {offsets = [0, 384], sizes = [8, 128], strides = [1, 1]} : vector<8x512xf32> to vector<8x128xf32>
    %108 = math.tanh %107 : vector<8x128xf32>
    %109 = arith.mulf %105, %86 : vector<8x128xf32>
    %110 = arith.mulf %104, %108 : vector<8x128xf32>
    %111 = arith.addf %109, %110 : vector<8x128xf32>
    %112 = math.tanh %111 : vector<8x128xf32>
    %113 = arith.mulf %106, %112 : vector<8x128xf32>
    %114 = arith.index_cast %c3_i32 : i32 to index
    %c0_42 = arith.constant 0 : index
    %c0_43 = arith.constant 0 : index
    %115 = vector.load %arg15[%114, %c0_42, %c0_43] : memref<8x8x128xf32, #tpu.memory_space<vmem>>, vector<1x8x128xf32>
    %116 = vector.shape_cast %115 : vector<1x8x128xf32> to vector<8x128xf32>
    %117 = vector.shape_cast %113 : vector<8x128xf32> to vector<1x8x128xf32>
    tpu.vector_store %arg15[%114, %c0_42, %c0_43], %117 {strides = array<i32>} : memref<8x8x128xf32, #tpu.memory_space<vmem>>, vector<1x8x128xf32>,
    %c4_i32 = arith.constant 4 : i32
    %118 = arith.index_cast %c4_i32 : i32 to index
    %c0_44 = arith.constant 0 : index
    %c0_45 = arith.constant 0 : index
    %119 = vector.load %arg14[%118, %c0_44, %c0_45] : memref<8x8x512xf32, #tpu.memory_space<vmem>>, vector<1x8x512xf32>
    %120 = vector.shape_cast %119 : vector<1x8x512xf32> to vector<8x512xf32>
    %cst_46 = arith.constant dense<0.000000e+00> : vector<8x512xf32>
    %121 = tpu.matmul %113, %15, %cst_46 {dimension_numbers = #tpu.dot_dimension_numbers<[1], [0], [0], [1], [0, 0, 1, 1], [], []>} : vector<8x128xf32>, vector<128x512xf32>, vector<8x512xf32> -> vector<8x512xf32>
    %122 = arith.addf %120, %121 : vector<8x512xf32>
    %123 = vector.extract_strided_slice %122 {offsets = [0, 0], sizes = [8, 384], strides = [1, 1]} : vector<8x512xf32> to vector<8x384xf32>
    %124 = arith.negf %123 : vector<8x384xf32>
    %125 = math.exp %124 : vector<8x384xf32>
    %cst_47 = arith.constant 1.000000e+00 : f32
    %126 = vector.broadcast %cst_47 : f32 to vector<8x384xf32>
    %127 = arith.addf %126, %125 : vector<8x384xf32>
    %128 = arith.divf %126, %127 : vector<8x384xf32>
    %129 = vector.extract_strided_slice %128 {offsets = [0, 0], sizes = [8, 128], strides = [1, 1]} : vector<8x384xf32> to vector<8x128xf32>
    %130 = vector.extract_strided_slice %128 {offsets = [0, 128], sizes = [8, 128], strides = [1, 1]} : vector<8x384xf32> to vector<8x128xf32>
    %131 = vector.extract_strided_slice %128 {offsets = [0, 256], sizes = [8, 128], strides = [1, 1]} : vector<8x384xf32> to vector<8x128xf32>
    %132 = vector.extract_strided_slice %122 {offsets = [0, 384], sizes = [8, 128], strides = [1, 1]} : vector<8x512xf32> to vector<8x128xf32>
    %133 = math.tanh %132 : vector<8x128xf32>
    %134 = arith.mulf %130, %111 : vector<8x128xf32>
    %135 = arith.mulf %129, %133 : vector<8x128xf32>
    %136 = arith.addf %134, %135 : vector<8x128xf32>
    %137 = math.tanh %136 : vector<8x128xf32>
    %138 = arith.mulf %131, %137 : vector<8x128xf32>
    %139 = arith.index_cast %c4_i32 : i32 to index
    %c0_48 = arith.constant 0 : index
    %c0_49 = arith.constant 0 : index
    %140 = vector.load %arg15[%139, %c0_48, %c0_49] : memref<8x8x128xf32, #tpu.memory_space<vmem>>, vector<1x8x128xf32>
    %141 = vector.shape_cast %140 : vector<1x8x128xf32> to vector<8x128xf32>
    %142 = vector.shape_cast %138 : vector<8x128xf32> to vector<1x8x128xf32>
    tpu.vector_store %arg15[%139, %c0_48, %c0_49], %142 {strides = array<i32>} : memref<8x8x128xf32, #tpu.memory_space<vmem>>, vector<1x8x128xf32>,
    %c5_i32 = arith.constant 5 : i32
    %143 = arith.index_cast %c5_i32 : i32 to index
    %c0_50 = arith.constant 0 : index
    %c0_51 = arith.constant 0 : index
    %144 = vector.load %arg14[%143, %c0_50, %c0_51] : memref<8x8x512xf32, #tpu.memory_space<vmem>>, vector<1x8x512xf32>
    %145 = vector.shape_cast %144 : vector<1x8x512xf32> to vector<8x512xf32>
    %cst_52 = arith.constant dense<0.000000e+00> : vector<8x512xf32>
    %146 = tpu.matmul %138, %15, %cst_52 {dimension_numbers = #tpu.dot_dimension_numbers<[1], [0], [0], [1], [0, 0, 1, 1], [], []>} : vector<8x128xf32>, vector<128x512xf32>, vector<8x512xf32> -> vector<8x512xf32>
    %147 = arith.addf %145, %146 : vector<8x512xf32>
    %148 = vector.extract_strided_slice %147 {offsets = [0, 0], sizes = [8, 384], strides = [1, 1]} : vector<8x512xf32> to vector<8x384xf32>
    %149 = arith.negf %148 : vector<8x384xf32>
    %150 = math.exp %149 : vector<8x384xf32>
    %cst_53 = arith.constant 1.000000e+00 : f32
    %151 = vector.broadcast %cst_53 : f32 to vector<8x384xf32>
    %152 = arith.addf %151, %150 : vector<8x384xf32>
    %153 = arith.divf %151, %152 : vector<8x384xf32>
    %154 = vector.extract_strided_slice %153 {offsets = [0, 0], sizes = [8, 128], strides = [1, 1]} : vector<8x384xf32> to vector<8x128xf32>
    %155 = vector.extract_strided_slice %153 {offsets = [0, 128], sizes = [8, 128], strides = [1, 1]} : vector<8x384xf32> to vector<8x128xf32>
    %156 = vector.extract_strided_slice %153 {offsets = [0, 256], sizes = [8, 128], strides = [1, 1]} : vector<8x384xf32> to vector<8x128xf32>
    %157 = vector.extract_strided_slice %147 {offsets = [0, 384], sizes = [8, 128], strides = [1, 1]} : vector<8x512xf32> to vector<8x128xf32>
    %158 = math.tanh %157 : vector<8x128xf32>
    %159 = arith.mulf %155, %136 : vector<8x128xf32>
    %160 = arith.mulf %154, %158 : vector<8x128xf32>
    %161 = arith.addf %159, %160 : vector<8x128xf32>
    %162 = math.tanh %161 : vector<8x128xf32>
    %163 = arith.mulf %156, %162 : vector<8x128xf32>
    %164 = arith.index_cast %c5_i32 : i32 to index
    %c0_54 = arith.constant 0 : index
    %c0_55 = arith.constant 0 : index
    %165 = vector.load %arg15[%164, %c0_54, %c0_55] : memref<8x8x128xf32, #tpu.memory_space<vmem>>, vector<1x8x128xf32>
    %166 = vector.shape_cast %165 : vector<1x8x128xf32> to vector<8x128xf32>
    %167 = vector.shape_cast %163 : vector<8x128xf32> to vector<1x8x128xf32>
    tpu.vector_store %arg15[%164, %c0_54, %c0_55], %167 {strides = array<i32>} : memref<8x8x128xf32, #tpu.memory_space<vmem>>, vector<1x8x128xf32>,
    %c6_i32 = arith.constant 6 : i32
    %168 = arith.index_cast %c6_i32 : i32 to index
    %c0_56 = arith.constant 0 : index
    %c0_57 = arith.constant 0 : index
    %169 = vector.load %arg14[%168, %c0_56, %c0_57] : memref<8x8x512xf32, #tpu.memory_space<vmem>>, vector<1x8x512xf32>
    %170 = vector.shape_cast %169 : vector<1x8x512xf32> to vector<8x512xf32>
    %cst_58 = arith.constant dense<0.000000e+00> : vector<8x512xf32>
    %171 = tpu.matmul %163, %15, %cst_58 {dimension_numbers = #tpu.dot_dimension_numbers<[1], [0], [0], [1], [0, 0, 1, 1], [], []>} : vector<8x128xf32>, vector<128x512xf32>, vector<8x512xf32> -> vector<8x512xf32>
    %172 = arith.addf %170, %171 : vector<8x512xf32>
    %173 = vector.extract_strided_slice %172 {offsets = [0, 0], sizes = [8, 384], strides = [1, 1]} : vector<8x512xf32> to vector<8x384xf32>
    %174 = arith.negf %173 : vector<8x384xf32>
    %175 = math.exp %174 : vector<8x384xf32>
    %cst_59 = arith.constant 1.000000e+00 : f32
    %176 = vector.broadcast %cst_59 : f32 to vector<8x384xf32>
    %177 = arith.addf %176, %175 : vector<8x384xf32>
    %178 = arith.divf %176, %177 : vector<8x384xf32>
    %179 = vector.extract_strided_slice %178 {offsets = [0, 0], sizes = [8, 128], strides = [1, 1]} : vector<8x384xf32> to vector<8x128xf32>
    %180 = vector.extract_strided_slice %178 {offsets = [0, 128], sizes = [8, 128], strides = [1, 1]} : vector<8x384xf32> to vector<8x128xf32>
    %181 = vector.extract_strided_slice %178 {offsets = [0, 256], sizes = [8, 128], strides = [1, 1]} : vector<8x384xf32> to vector<8x128xf32>
    %182 = vector.extract_strided_slice %172 {offsets = [0, 384], sizes = [8, 128], strides = [1, 1]} : vector<8x512xf32> to vector<8x128xf32>
    %183 = math.tanh %182 : vector<8x128xf32>
    %184 = arith.mulf %180, %161 : vector<8x128xf32>
    %185 = arith.mulf %179, %183 : vector<8x128xf32>
    %186 = arith.addf %184, %185 : vector<8x128xf32>
    %187 = math.tanh %186 : vector<8x128xf32>
    %188 = arith.mulf %181, %187 : vector<8x128xf32>
    %189 = arith.index_cast %c6_i32 : i32 to index
    %c0_60 = arith.constant 0 : index
    %c0_61 = arith.constant 0 : index
    %190 = vector.load %arg15[%189, %c0_60, %c0_61] : memref<8x8x128xf32, #tpu.memory_space<vmem>>, vector<1x8x128xf32>
    %191 = vector.shape_cast %190 : vector<1x8x128xf32> to vector<8x128xf32>
    %192 = vector.shape_cast %188 : vector<8x128xf32> to vector<1x8x128xf32>
    tpu.vector_store %arg15[%189, %c0_60, %c0_61], %192 {strides = array<i32>} : memref<8x8x128xf32, #tpu.memory_space<vmem>>, vector<1x8x128xf32>,
    %c7_i32 = arith.constant 7 : i32
    %193 = arith.index_cast %c7_i32 : i32 to index
    %c0_62 = arith.constant 0 : index
    %c0_63 = arith.constant 0 : index
    %194 = vector.load %arg14[%193, %c0_62, %c0_63] : memref<8x8x512xf32, #tpu.memory_space<vmem>>, vector<1x8x512xf32>
    %195 = vector.shape_cast %194 : vector<1x8x512xf32> to vector<8x512xf32>
    %cst_64 = arith.constant dense<0.000000e+00> : vector<8x512xf32>
    %196 = tpu.matmul %188, %15, %cst_64 {dimension_numbers = #tpu.dot_dimension_numbers<[1], [0], [0], [1], [0, 0, 1, 1], [], []>} : vector<8x128xf32>, vector<128x512xf32>, vector<8x512xf32> -> vector<8x512xf32>
    %197 = arith.addf %195, %196 : vector<8x512xf32>
    %198 = vector.extract_strided_slice %197 {offsets = [0, 0], sizes = [8, 384], strides = [1, 1]} : vector<8x512xf32> to vector<8x384xf32>
    %199 = arith.negf %198 : vector<8x384xf32>
    %200 = math.exp %199 : vector<8x384xf32>
    %cst_65 = arith.constant 1.000000e+00 : f32
    %201 = vector.broadcast %cst_65 : f32 to vector<8x384xf32>
    %202 = arith.addf %201, %200 : vector<8x384xf32>
    %203 = arith.divf %201, %202 : vector<8x384xf32>
    %204 = vector.extract_strided_slice %203 {offsets = [0, 0], sizes = [8, 128], strides = [1, 1]} : vector<8x384xf32> to vector<8x128xf32>
    %205 = vector.extract_strided_slice %203 {offsets = [0, 128], sizes = [8, 128], strides = [1, 1]} : vector<8x384xf32> to vector<8x128xf32>
    %206 = vector.extract_strided_slice %203 {offsets = [0, 256], sizes = [8, 128], strides = [1, 1]} : vector<8x384xf32> to vector<8x128xf32>
    %207 = vector.extract_strided_slice %197 {offsets = [0, 384], sizes = [8, 128], strides = [1, 1]} : vector<8x512xf32> to vector<8x128xf32>
    %208 = math.tanh %207 : vector<8x128xf32>
    %209 = arith.mulf %205, %186 : vector<8x128xf32>
    %210 = arith.mulf %204, %208 : vector<8x128xf32>
    %211 = arith.addf %209, %210 : vector<8x128xf32>
    %212 = math.tanh %211 : vector<8x128xf32>
    %213 = arith.mulf %206, %212 : vector<8x128xf32>
    %214 = arith.index_cast %c7_i32 : i32 to index
    %c0_66 = arith.constant 0 : index
    %c0_67 = arith.constant 0 : index
    %215 = vector.load %arg15[%214, %c0_66, %c0_67] : memref<8x8x128xf32, #tpu.memory_space<vmem>>, vector<1x8x128xf32>
    %216 = vector.shape_cast %215 : vector<1x8x128xf32> to vector<8x128xf32>
    %217 = vector.shape_cast %213 : vector<8x128xf32> to vector<1x8x128xf32>
    tpu.vector_store %arg15[%214, %c0_66, %c0_67], %217 {strides = array<i32>} : memref<8x8x128xf32, #tpu.memory_space<vmem>>, vector<1x8x128xf32>,
    %c8_i32 = arith.constant 8 : i32
    %c0_68 = arith.constant 0 : index
    %c0_69 = arith.constant 0 : index
    %c0_70 = arith.constant 0 : index
    %218 = vector.load %arg15[%c0_68, %c0_69, %c0_70] : memref<8x8x128xf32, #tpu.memory_space<vmem>>, vector<8x8x128xf32>
    %219 = vector.shape_cast %218 : vector<8x8x128xf32> to vector<64x128xf32>
    %c0_71 = arith.constant 0 : index
    %c0_72 = arith.constant 0 : index
    %220 = vector.load %arg9[%c0_71, %c0_72] : memref<128x128xf32, #tpu.memory_space<vmem>>, vector<128x128xf32>
    %cst_73 = arith.constant dense<0.000000e+00> : vector<64x128xf32>
    %221 = tpu.matmul %219, %220, %cst_73 {dimension_numbers = #tpu.dot_dimension_numbers<[1], [0], [0], [1], [0, 0, 1, 1], [], []>} : vector<64x128xf32>, vector<128x128xf32>, vector<64x128xf32> -> vector<64x128xf32>
    %c0_74 = arith.constant 0 : index
    %c0_75 = arith.constant 0 : index
    %222 = vector.load %arg10[%c0_74, %c0_75] : memref<1x128xf32, #tpu.memory_space<vmem>>, vector<1x128xf32>
    %223 = vector.broadcast %222 : vector<1x128xf32> to vector<64x128xf32>
    %224 = arith.addf %221, %223 : vector<64x128xf32>
    %c0_76 = arith.constant 0 : index
    %c0_77 = arith.constant 0 : index
    %225 = vector.load %arg11[%c0_76, %c0_77] : memref<64x128xf32, #tpu.memory_space<vmem>>, vector<64x128xf32>
    tpu.vector_store %arg11[%c0_76, %c0_77], %224 {strides = array<i32>} : memref<64x128xf32, #tpu.memory_space<vmem>>, vector<64x128xf32>,
    %c0_78 = arith.constant 0 : index
    %c0_79 = arith.constant 0 : index
    %226 = vector.load %arg12[%c0_78, %c0_79] : memref<8x128xf32, #tpu.memory_space<vmem>>, vector<8x128xf32>
    tpu.vector_store %arg12[%c0_78, %c0_79], %213 {strides = array<i32>} : memref<8x128xf32, #tpu.memory_space<vmem>>, vector<8x128xf32>,
    %c0_80 = arith.constant 0 : index
    %c0_81 = arith.constant 0 : index
    %227 = vector.load %arg13[%c0_80, %c0_81] : memref<8x128xf32, #tpu.memory_space<vmem>>, vector<8x128xf32>
    tpu.vector_store %arg13[%c0_80, %c0_81], %211 {strides = array<i32>} : memref<8x128xf32, #tpu.memory_space<vmem>>, vector<8x128xf32>,
    return
  }
  func.func @transform_0(%arg0: i32) -> (i32, i32) {
    %c0_i32 = arith.constant 0 : i32
    %c0_i32_0 = arith.constant 0 : i32
    %c0_i32_1 = arith.constant 0 : i32
    return %c0_i32, %c0_i32_0 : i32, i32
  }
  func.func @transform_1(%arg0: i32) -> (i32, i32) {
    %c0_i32 = arith.constant 0 : i32
    %c0_i32_0 = arith.constant 0 : i32
    %c0_i32_1 = arith.constant 0 : i32
    return %c0_i32, %c0_i32_0 : i32, i32
  }
  func.func @transform_2(%arg0: i32) -> (i32, i32) {
    %c0_i32 = arith.constant 0 : i32
    %c0_i32_0 = arith.constant 0 : i32
    %c0_i32_1 = arith.constant 0 : i32
    return %c0_i32, %c0_i32_0 : i32, i32
  }
  func.func @transform_3(%arg0: i32) -> (i32, i32) {
    %c0_i32 = arith.constant 0 : i32
    %c0_i32_0 = arith.constant 0 : i32
    %c0_i32_1 = arith.constant 0 : i32
    return %c0_i32, %c0_i32_0 : i32, i32
  }
  func.func @transform_4(%arg0: i32) -> (i32, i32) {
    %c0_i32 = arith.constant 0 : i32
    %c0_i32_0 = arith.constant 0 : i32
    %c0_i32_1 = arith.constant 0 : i32
    return %c0_i32, %c0_i32_0 : i32, i32
  }
  func.func @transform_5(%arg0: i32) -> (i32, i32) {
    %c0_i32 = arith.constant 0 : i32
    %c0_i32_0 = arith.constant 0 : i32
    %c0_i32_1 = arith.constant 0 : i32
    return %c0_i32, %c0_i32_0 : i32, i32
  }
  func.func @transform_6(%arg0: i32) -> (i32, i32) {
    %c0_i32 = arith.constant 0 : i32
    %c0_i32_0 = arith.constant 0 : i32
    %c0_i32_1 = arith.constant 0 : i32
    return %c0_i32, %c0_i32_0 : i32, i32
  }
  func.func @transform_7(%arg0: i32) -> (i32, i32) {
    %c0_i32 = arith.constant 0 : i32
    %c0_i32_0 = arith.constant 0 : i32
    %c0_i32_1 = arith.constant 0 : i32
    return %c0_i32, %c0_i32_0 : i32, i32
  }
  func.func @transform_8(%arg0: i32) -> (i32, i32) {
    %c0_i32 = arith.constant 0 : i32
    %c0_i32_0 = arith.constant 0 : i32
    %c0_i32_1 = arith.constant 0 : i32
    return %c0_i32, %c0_i32_0 : i32, i32
  }
  func.func @transform_9(%arg0: i32) -> (i32, i32) {
    %c0_i32 = arith.constant 0 : i32
    %c0_i32_0 = arith.constant 0 : i32
    %c0_i32_1 = arith.constant 0 : i32
    return %c0_i32, %c0_i32_0 : i32, i32
  }
  func.func @transform_10(%arg0: i32) -> (i32, i32) {
    %c0_i32 = arith.constant 0 : i32
    %c0_i32_0 = arith.constant 0 : i32
    %c0_i32_1 = arith.constant 0 : i32
    return %c0_i32, %c0_i32_0 : i32, i32
  }
  func.func @transform_11(%arg0: i32) -> (i32, i32) {
    %c0_i32 = arith.constant 0 : i32
    %c0_i32_0 = arith.constant 0 : i32
    %c0_i32_1 = arith.constant 0 : i32
    return %c0_i32, %c0_i32_0 : i32, i32
  }
  func.func @transform_12(%arg0: i32) -> (i32, i32) {
    %c0_i32 = arith.constant 0 : i32
    %c0_i32_0 = arith.constant 0 : i32
    %c0_i32_1 = arith.constant 0 : i32
    return %c0_i32, %c0_i32_0 : i32, i32
  }
}

</mosaic_0001>

<bundles_post_ra>
// kernel: drqn_lstm_forward.1
= control target key start
LH: loop header
LB: loop body
LE: loop exit
PB: predicated region body
PF: predicated region fallthrough
CT: control target
= control target key end

     0   :  { %vm79_vm0 = vcmask 1043456   ;;  %vm54_vm1 = vcmask 31744   ;;  %s4279_s3 = inlined_call_operand.vmem [shape: f32[4,128], index: 3, kind: input, shape index: {}]   ;;  %s4280_s0 = inlined_call_operand.vmem [shape: f32[64,4], index: 0, kind: input, shape index: {}]   ;;  %s4281_s5 = inlined_call_operand.vmem [shape: f32[128,512], index: 5, kind: input, shape index: {}]   ;;  %s4282_s7 = inlined_call_operand.vmem [shape: f32[128,512], index: 7, kind: input, shape index: {}]   ;;  %s4283_s1 = inlined_call_operand.vmem [shape: f32[8,128], index: 1, kind: input, shape index: {}]   ;;  %s4284_s4 = inlined_call_operand.vmem [shape: f32[1,128], index: 4, kind: input, shape index: {}]   ;;  %s4285_s6 = inlined_call_operand.vmem [shape: f32[1,512], index: 6, kind: input, shape index: {}]   ;;  %s4286_s2 = inlined_call_operand.vmem [shape: f32[8,128], index: 2, kind: input, shape index: {}]   ;;  %s4287_s8 = inlined_call_operand.vmem [shape: f32[128,128], index: 8, kind: input, shape index: {}]   ;;  %s4288_s9 = inlined_call_operand.vmem [shape: f32[1,128], index: 9, kind: input, shape index: {}]   ;;  %s4289_s10 = inlined_call_operand.vmem [shape: f32[64,128], index: 10, kind: output, shape index: {0}]   ;;  %s4290_s12 = inlined_call_operand.vmem [shape: f32[8,128], index: 12, kind: output, shape index: {2}]   ;;  %s4291_s11 = inlined_call_operand.vmem [shape: f32[8,128], index: 11, kind: output, shape index: {1}]  }
   0x1   :  { %v46_v0 = vld [vmem:[%s4279_s3] sm:$0xf]  ;;  %v39_v2 = vld [vmem:[%s4280_s0 + $0x8] sm:$0xff]  ;;  %v40_v3 = vld [vmem:[%s4280_s0 + $0x10] sm:$0xff] }
   0x2   :  { %v38_v1 = vld [vmem:[%s4280_s0] sm:$0xff]  ;;  %2246 = vmatprep.subr.msk.mxu1 %vm79_vm0, %v46_v0  ;;  %v257_v4 = vld [vmem:[%s4281_s5 + $0x1e8] sm:$0xff]  ;;  %v41_v7 = vld [vmem:[%s4280_s0 + $0x18] sm:$0xff] }
   0x3   :  { %2248 = vmatprep.mubr.msk.f32.mxu1 %vm54_vm1, %v38_v1  ;;  %2247 = vmatpush3.msk.msra.mxu1 %vm79_vm0, %v46_v0  ;;  %v256_v5 = vld [vmem:[%s4281_s5 + $0x1e0] sm:$0xff]  ;;  %v253_v6 = vld [vmem:[%s4281_s5 + $0x1c8] sm:$0xff]  ;;  %v44_v19 = vld [vmem:[%s4280_s0 + $0x30] sm:$0xff] }
   0x4   :  { %2249 = vmatmul.mubr.msk.f32.vlgmr.msra.gmra.mxu1 %vm54_vm1, %v39_v2  ;;  %282 = vmatprep.subr.mxu0 %v257_v4  ;;  %v252_v8 = vld [vmem:[%s4281_s5 + $0x1c0] sm:$0xff]  ;;  %v2596_v9 = vld [vmem:[%s4282_s7 + $0x1e8] sm:$0xff]  ;;  %v45_v25 = vld [vmem:[%s4280_s0 + $0x38] sm:$0xff] }
   0x5   :  { %2251 = vmatprep.mubr.msk.f32.mxu1 %vm54_vm1, %v40_v3  ;;  %v42_v10 = vld [vmem:[%s4280_s0 + $0x20] sm:$0xff]  ;;  %283 = vmatpush1.msra.mxu0 %v256_v5  ;;  %v249_v11 = vld [vmem:[%s4281_s5 + $0x1a8] sm:$0xff] }
   0x6   :  { %610 = vmatprep.subr.mxu1 %v2596_v9  ;;  %v2608_v12 = vld [vmem:[%s4282_s7 + $0x1e0] sm:$0xff]  ;;  %284 = vmatprep.subr.mxu0 %v253_v6  ;;  %v2617_v14 = vld [vmem:[%s4282_s7 + $0x1c8] sm:$0xff] }
   0x7   :  { %611 = vmatpush1.msra.mxu1 %v2608_v12  ;;  %v248_v13 = vld [vmem:[%s4281_s5 + $0x1a0] sm:$0xff]  ;;  %285 = vmatpush1.msra.mxu0 %v252_v8  ;;  %v245_v15 = vld [vmem:[%s4281_s5 + $0x188] sm:$0xff]  ;;  %v259_v8 = vld [vmem:[%s4281_s5 + $0x1f8] sm:$0xff] }
   0x8   :  { %2252 = vmatmul.mubr.msk.f32.gmra.mxu1 %vm54_vm1, %v41_v7  ;;  %v2626_v16 = vld [vmem:[%s4282_s7 + $0x1c0] sm:$0xff]  ;;  %v43_v17 = vld [vmem:[%s4280_s0 + $0x28] sm:$0xff]  ;;  %286 = vmatprep.subr.mxu0 %v249_v11  ;;  %v4294_v7 = vmov 0.0  }
   0x9   :  { %2254 = vmatprep.mubr.msk.f32.mxu1 %vm54_vm1, %v42_v10  ;;  %v244_v18 = vld [vmem:[%s4281_s5 + $0x180] sm:$0xff]  ;;  %287 = vmatpush1.msra.mxu0 %v248_v13  ;;  %v2642_v20 = vld [vmem:[%s4282_s7 + $0x1a8] sm:$0xff] }
   0xa   :  { %612 = vmatprep.subr.mxu1 %v2617_v14  ;;  %288 = vmatprep.subr.mxu0 %v245_v15  ;;  %v241_v21 = vld [vmem:[%s4281_s5 + $0x168] sm:$0xff]  ;;  %v2651_v22 = vld [vmem:[%s4282_s7 + $0x1a0] sm:$0xff] }
   0xb   :  { %613 = vmatpush1.msra.mxu1 %v2626_v16  ;;  %289 = vmatpush1.msra.mxu0 %v244_v18  ;;  %v240_v23 = vld [vmem:[%s4281_s5 + $0x160] sm:$0xff]  ;;  %v2660_v24 = vld [vmem:[%s4282_s7 + $0x188] sm:$0xff] }
   0xc   :  { %2255 = vmatmul.mubr.msk.f32.gmra.mxu1 %vm54_vm1, %v43_v17  ;;  %614 = vmatprep.subr.mxu1 %v2642_v20  ;;  %v237_v26 = vld [vmem:[%s4281_s5 + $0x148] sm:$0xff]  ;;  %v2674_v27 = vld [vmem:[%s4282_s7 + $0x180] sm:$0xff] }
   0xd   :  { %2257 = vmatprep.mubr.msk.f32.mxu1 %vm54_vm1, %v44_v19  ;;  %290 = vmatprep.subr.mxu0 %v241_v21  ;;  %v236_v28 = vld [vmem:[%s4281_s5 + $0x140] sm:$0xff]  ;;  %v2683_v29 = vld [vmem:[%s4282_s7 + $0x168] sm:$0xff] }
   0xe   :  { %615 = vmatpush1.msra.mxu1 %v2651_v22  ;;  %291 = vmatpush1.msra.mxu0 %v240_v23  ;;  %v233_v30 = vld [vmem:[%s4281_s5 + $0x128] sm:$0xff]  ;;  %v2692_v31 = vld [vmem:[%s4282_s7 + $0x160] sm:$0xff] }
   0xf   :  { %616 = vmatprep.subr.mxu1 %v2660_v24  ;;  %292 = vmatprep.subr.mxu0 %v237_v26  ;;  %v232_v32 = vld [vmem:[%s4281_s5 + $0x120] sm:$0xff]  ;;  %v2701_v33 = vld [vmem:[%s4282_s7 + $0x148] sm:$0xff] }
  0x10   :  { %2258 = vmatmul.mubr.msk.f32.gmra.mxu1 %vm54_vm1, %v45_v25  ;;  %293 = vmatpush1.msra.mxu0 %v236_v28  ;;  %v229_v34 = vld [vmem:[%s4281_s5 + $0x108] sm:$0xff]  ;;  %v2710_v35 = vld [vmem:[%s4282_s7 + $0x140] sm:$0xff]  ;;  %v255_v28 = vld [vmem:[%s4281_s5 + $0x1d8] sm:$0xff] }
  0x11   :  { %617 = vmatpush1.msra.mxu1 %v2674_v27  ;;  %294 = vmatprep.subr.mxu0 %v233_v30  ;;  %v228_v36 = vld [vmem:[%s4281_s5 + $0x100] sm:$0xff]  ;;  %v2719_v37 = vld [vmem:[%s4282_s7 + $0x128] sm:$0xff]  ;;  %v254_v30 = vld [vmem:[%s4281_s5 + $0x1d0] sm:$0xff] }
  0x12   :  { %618 = vmatprep.subr.mxu1 %v2683_v29  ;;  %295 = vmatpush1.msra.mxu0 %v232_v32  ;;  %v225_v38 = vld [vmem:[%s4281_s5 + $0xe8] sm:$0xff]  ;;  %v2728_v39 = vld [vmem:[%s4282_s7 + $0x120] sm:$0xff]  ;;  %v251_v32 = vld [vmem:[%s4281_s5 + $0x1b8] sm:$0xff] }
  0x13   :  { %619 = vmatpush1.msra.mxu1 %v2692_v31  ;;  %296 = vmatprep.subr.mxu0 %v229_v34  ;;  %v224_v40 = vld [vmem:[%s4281_s5 + $0xe0] sm:$0xff]  ;;  %v2737_v41 = vld [vmem:[%s4282_s7 + $0x108] sm:$0xff] }
  0x14   :  { %620 = vmatprep.subr.mxu1 %v2701_v33  ;;  %297 = vmatpush1.msra.mxu0 %v228_v36  ;;  %v221_v42 = vld [vmem:[%s4281_s5 + $0xc8] sm:$0xff]  ;;  %v2746_v43 = vld [vmem:[%s4282_s7 + $0x100] sm:$0xff] }
  0x15   :  { %621 = vmatpush1.msra.mxu1 %v2710_v35  ;;  %298 = vmatprep.subr.mxu0 %v225_v38  ;;  %v220_v44 = vld [vmem:[%s4281_s5 + $0xc0] sm:$0xff]  ;;  %v2755_v45 = vld [vmem:[%s4282_s7 + $0xe8] sm:$0xff]  ;;  %v250_v38 = vld [vmem:[%s4281_s5 + $0x1b0] sm:$0xff] }
  0x16   :  { %622 = vmatprep.subr.mxu1 %v2719_v37  ;;  %299 = vmatpush1.msra.mxu0 %v224_v40  ;;  %v217_v46 = vld [vmem:[%s4281_s5 + $0xa8] sm:$0xff]  ;;  %v2764_v47 = vld [vmem:[%s4282_s7 + $0xe0] sm:$0xff]  ;;  %v247_v40 = vld [vmem:[%s4281_s5 + $0x198] sm:$0xff] }
  0x17   :  { %623 = vmatpush1.msra.mxu1 %v2728_v39  ;;  %300 = vmatprep.subr.mxu0 %v221_v42  ;;  %v216_v48 = vld [vmem:[%s4281_s5 + $0xa0] sm:$0xff]  ;;  %v2773_v49 = vld [vmem:[%s4282_s7 + $0xc8] sm:$0xff] }
  0x18   :  { %624 = vmatprep.subr.mxu1 %v2737_v41  ;;  %301 = vmatpush1.msra.mxu0 %v220_v44  ;;  %v213_v50 = vld [vmem:[%s4281_s5 + $0x88] sm:$0xff]  ;;  %v2782_v51 = vld [vmem:[%s4282_s7 + $0xc0] sm:$0xff]  ;;  %v246_v44 = vld [vmem:[%s4281_s5 + $0x190] sm:$0xff] }
  0x19   :  { %625 = vmatpush1.msra.mxu1 %v2746_v43  ;;  %302 = vmatprep.subr.mxu0 %v217_v46  ;;  %v212_v52 = vld [vmem:[%s4281_s5 + $0x80] sm:$0xff]  ;;  %v2791_v53 = vld [vmem:[%s4282_s7 + $0xa8] sm:$0xff]  ;;  %v243_v46 = vld [vmem:[%s4281_s5 + $0x178] sm:$0xff] }
  0x1a   :  { %626 = vmatprep.subr.mxu1 %v2755_v45  ;;  %303 = vmatpush1.msra.mxu0 %v216_v48  ;;  %4398 = vst [vmem:[#allocation4_spill] sm:$0xff] %v2791_v53  ;;  %v209_v54 = vld [vmem:[%s4281_s5 + $0x68] sm:$0xff]  ;;  %v2800_v55 = vld [vmem:[%s4282_s7 + $0xa0] sm:$0xff] }
  0x1b   :  { %627 = vmatpush1.msra.mxu1 %v2764_v47  ;;  %304 = vmatprep.subr.mxu0 %v213_v50  ;;  %4399 = vst [vmem:[#allocation5_spill] sm:$0xff] %v2800_v55  ;;  %v208_v56 = vld [vmem:[%s4281_s5 + $0x60] sm:$0xff]  ;;  %v2809_v57 = vld [vmem:[%s4282_s7 + $0x88] sm:$0xff] }
  0x1c   :  { %628 = vmatprep.subr.mxu1 %v2773_v49  ;;  %305 = vmatpush1.msra.mxu0 %v212_v52  ;;  %4400 = vst [vmem:[#allocation6_spill] sm:$0xff] %v2809_v57  ;;  %v2817_v58 = vld [vmem:[%s4282_s7 + $0x80] sm:$0xff]  ;;  %v205_v59 = vld [vmem:[%s4281_s5 + $0x48] sm:$0xff]  ;;  %v242_v52 = vld [vmem:[%s4281_s5 + $0x170] sm:$0xff] }
  0x1d   :  { %629 = vmatpush1.msra.mxu1 %v2782_v51  ;;  %306 = vmatprep.subr.mxu0 %v209_v54  ;;  %4401 = vst [vmem:[#allocation7_spill] sm:$0xff] %v2817_v58  ;;  %v2826_v60 = vld [vmem:[%s4282_s7 + $0x68] sm:$0xff]  ;;  %v204_v61 = vld [vmem:[%s4281_s5 + $0x40] sm:$0xff] }
  0x1e   :  { %630 = vmatprep.subr.mxu1 %v2791_v53  ;;  %307 = vmatpush1.msra.mxu0 %v208_v56  ;;  %4402 = vst [vmem:[#allocation8_spill] sm:$0xff] %v2826_v60  ;;  %v2835_v62 = vld [vmem:[%s4282_s7 + $0x60] sm:$0xff]  ;;  %v201_v63 = vld [vmem:[%s4281_s5 + $0x28] sm:$0xff]  ;;  %v239_v56 = vld [vmem:[%s4281_s5 + $0x158] sm:$0xff] }
  0x1f   :  { %631 = vmatpush1.msra.mxu1 %v2800_v55  ;;  %308 = vmatprep.subr.mxu0 %v205_v59  ;;  %4403 = vst [vmem:[#allocation9_spill] sm:$0xff] %v2835_v62  ;;  %v2844_v0 = vld [vmem:[%s4282_s7 + $0x48] sm:$0xff]  ;;  %v200_v1 = vld [vmem:[%s4281_s5 + $0x20] sm:$0xff]  ;;  %v238_v59 = vld [vmem:[%s4281_s5 + $0x150] sm:$0xff] }
  0x20   :  { %632 = vmatprep.subr.mxu1 %v2809_v57  ;;  %309 = vmatpush1.msra.mxu0 %v204_v61  ;;  %4404 = vst [vmem:[#allocation10_spill] sm:$0xff] %v2844_v0  ;;  %v2853_v2 = vld [vmem:[%s4282_s7 + $0x40] sm:$0xff]  ;;  %v197_v3 = vld [vmem:[%s4281_s5 + $0x8] sm:$0xff]  ;;  %v235_v61 = vld [vmem:[%s4281_s5 + $0x138] sm:$0xff] }
  0x21   :  { %633 = vmatpush1.msra.mxu1 %v2817_v58  ;;  %310 = vmatprep.subr.mxu0 %v201_v63  ;;  %4405 = vst [vmem:[#allocation11_spill] sm:$0xff] %v2853_v2  ;;  %v2862_v4 = vld [vmem:[%s4282_s7 + $0x28] sm:$0xff]  ;;  %v196_v5 = vld [vmem:[%s4281_s5] sm:$0xff] }
  0x22   :  { %634 = vmatprep.subr.mxu1 %v2826_v60  ;;  %311 = vmatpush1.msra.mxu0 %v200_v1  ;;  %4406 = vst [vmem:[#allocation12_spill] sm:$0xff] %v2862_v4  ;;  %v2871_v6 = vld [vmem:[%s4282_s7 + $0x20] sm:$0xff]  ;;  %v2880_v10 = vld [vmem:[%s4282_s7 + $0x8] sm:$0xff] }
  0x23   :  { %635 = vmatpush1.msra.mxu1 %v2835_v62  ;;  %312 = vmatprep.subr.mxu0 %v197_v3  ;;  %4407 = vst [vmem:[#allocation13_spill] sm:$0xff] %v2871_v6  ;;  %4408 = vst [vmem:[#allocation14_spill] sm:$0xff] %v2880_v10  ;;  %v2886_v11 = vld [vmem:[%s4282_s7] sm:$0xff]  ;;  %v234_v3 = vld [vmem:[%s4281_s5 + $0x130] sm:$0xff] }
  0x24   :  { %636 = vmatprep.subr.mxu1 %v2844_v0  ;;  %313 = vmatpush1.msra.mxu0 %v196_v5  ;;  %4409 = vst [vmem:[#allocation15_spill] sm:$0xff] %v2886_v11  ;;  %v2893_v13 = vld [vmem:[%s4283_s1] sm:$0xff]  ;;  %v231_v5 = vld [vmem:[%s4281_s5 + $0x118] sm:$0xff] }
  0x25   :  { %637 = vmatpush1.msra.mxu1 %v2853_v2  ;;  %346 = vmatprep.mubr.f32.mxu0 %v4294_v7  ;;  %v2934_v17 = vld [vmem:[%s4284_s4] ss:$0 sm:$0xff] }
  0x26   :  { %638 = vmatprep.subr.mxu1 %v2862_v4  ;;  %395 = vmatprep.subr.mxu0 %v259_v8 }
  0x27   :  { %639 = vmatpush1.msra.mxu1 %v2871_v6  ;;  %674 = vmatprep.mubr.f32.mxu1 %v4294_v7 }
  0x28   :  { %640 = vmatprep.subr.mxu1 %v2880_v10 }
  0x29   :  { %641 = vmatpush1.msra.mxu1 %v2886_v11 }
  0x2a   :  { %675 = vmatmul.mubr.f32.vlgmr.msra.gmra.mxu1 %v2893_v13  ;;  %786 = vmatprep.subr.mxu1 %v2596_v9 }
  0x2b   :  { %787 = vmatpush1.msra.mxu1 %v2608_v12  ;;  %850 = vmatprep.mubr.f32.mxu1 %v4294_v7 }
  0x2c   :  { %788 = vmatprep.subr.mxu1 %v2617_v14 }
  0x2d   :  { %789 = vmatpush1.msra.mxu1 %v2626_v16 }
  0x2e   :  { %790 = vmatprep.subr.mxu1 %v2642_v20 }
  0x2f   :  { %791 = vmatpush1.msra.mxu1 %v2651_v22 }
  0x30   :  { %792 = vmatprep.subr.mxu1 %v2660_v24 }
  0x31   :  { %793 = vmatpush1.msra.mxu1 %v2674_v27 }
  0x32   :  { %794 = vmatprep.subr.mxu1 %v2683_v29 }
  0x33   :  { %795 = vmatpush1.msra.mxu1 %v2692_v31 }
  0x34   :  { %796 = vmatprep.subr.mxu1 %v2701_v33 }
  0x35   :  { %797 = vmatpush1.msra.mxu1 %v2710_v35 }
  0x36   :  { %798 = vmatprep.subr.mxu1 %v2719_v37 }
  0x37   :  { %799 = vmatpush1.msra.mxu1 %v2728_v39 }
  0x38   :  { %800 = vmatprep.subr.mxu1 %v2737_v41 }
  0x39   :  { %801 = vmatpush1.msra.mxu1 %v2746_v43 }
  0x3a   :  { %802 = vmatprep.subr.mxu1 %v2755_v45 }
  0x3b   :  { %803 = vmatpush1.msra.mxu1 %v2764_v47 }
  0x3c   :  { %804 = vmatprep.subr.mxu1 %v2773_v49 }
  0x3d   :  { %805 = vmatpush1.msra.mxu1 %v2782_v51 }
  0x3e   :  { %806 = vmatprep.subr.mxu1 %v2791_v53 }
  0x3f   :  { %807 = vmatpush1.msra.mxu1 %v2800_v55 }
  0x40   :  { %808 = vmatprep.subr.mxu1 %v2809_v57 }
  0x41   :  { %809 = vmatpush1.msra.mxu1 %v2817_v58 }
  0x42   :  { %810 = vmatprep.subr.mxu1 %v2826_v60 }
  0x43   :  { %811 = vmatpush1.msra.mxu1 %v2835_v62 }
  0x44   :  { %812 = vmatprep.subr.mxu1 %v2844_v0 }
  0x45   :  { %813 = vmatpush1.msra.mxu1 %v2853_v2 }
  0x46   :  { %814 = vmatprep.subr.mxu1 %v2862_v4 }
  0x47   :  { %815 = vmatpush1.msra.mxu1 %v2871_v6  ;;  %v4424_v6 = vmov 0.0  }
  0x48   :  { %816 = vmatprep.subr.mxu1 %v2880_v10  ;;  %v3295_v10 = vld [vmem:[%s4282_s7 + $0x10] sm:$0xff] }
  0x49   :  { %817 = vmatpush1.msra.mxu1 %v2886_v11  ;;  %v3275_v11 = vld [vmem:[%s4282_s7 + $0x38] sm:$0xff]  ;;  %4423 = vst [vmem:[#allocation28_spill] sm:$0xff] %v3295_v10 }
  0x4a   :  { %963 = vmatprep.subr.mxu1 %v2596_v9  ;;  %v258_v9 = vld [vmem:[%s4281_s5 + $0x1f0] sm:$0xff]  ;;  %4419 = vst [vmem:[#allocation25_spill] sm:$0xff] %v3275_v11 }
  0xc4   :  { %v2250_v15 = vpop.f32.mrf.mxu1 }
  0xc5   :  { %v2940_v23 = vadd.f32 %v2250_v15, %v2934_v17  ;;  %v230_v15 = vld [vmem:[%s4281_s5 + $0x110] sm:$0xff] }
  0xc6   :  { %v149_v18 = vpop.f32.mrf.mxu1 }
  0xc7   :  { %v2937_v19 = vadd.f32 %v2934_v17, %v149_v18  ;;  %v189_v34 = vmax.f32 %v2940_v23, 0.0  ;;  %v227_v18 = vld [vmem:[%s4281_s5 + $0xf8] sm:$0xff]  ;;  %v3146_v23 = vld [vmem:[%s4282_s7 + $0x170] sm:$0xff] }
  0xc8   :  { %v2253_v21 = vpop.f32.mrf.mxu1 }
  0xc9   :  { %v188_v25 = vmax.f32 %v2937_v19, 0.0  ;;  %v2978_v48 = vadd.f32 %v2253_v21, %v2934_v17  ;;  %v3119_v19 = vld [vmem:[%s4282_s7 + $0x1b0] sm:$0xff] }
  0xca   :  { %v159_v26 = vpop.f32.mrf.mxu1 }
  0xcb   :  { %347 = vmatmul.mubr.f32.vlgmr.msra.gmra.mxu0 %v188_v25  ;;  %v2960_v36 = vadd.f32 %v2934_v17, %v159_v26  ;;  %v191_v63 = vmax.f32 %v2978_v48, 0.0  ;;  %v226_v26 = vld [vmem:[%s4281_s5 + $0xf0] sm:$0xff] }
  0xcc   :  { %396 = vmatpush1.msra.mxu0 %v258_v9  ;;  %352 = vmatprep.mubr.f32.mxu0 %v4294_v7  ;;  %v2256_v42 = vpop.f32.mrf.mxu1  ;;  %v3200_v48 = vld [vmem:[%s4282_s7 + $0xf0] sm:$0xff] }
  0xcd   :  { %397 = vmatprep.subr.mxu0 %v255_v28  ;;  %v190_v50 = vmax.f32 %v2960_v36, 0.0  ;;  %v3016_v21 = vadd.f32 %v2256_v42, %v2934_v17  ;;  %v3173_v36 = vld [vmem:[%s4282_s7 + $0x130] sm:$0xff] }
  0xce   :  { %398 = vmatpush1.msra.mxu0 %v254_v30  ;;  %v169_v54 = vpop.f32.mrf.mxu1  ;;  %v223_v30 = vld [vmem:[%s4281_s5 + $0xd8] sm:$0xff] }
  0xcf   :  { %399 = vmatprep.subr.mxu0 %v251_v32  ;;  %353 = vmatmul.mubr.f32.gmra.mxu0 %v189_v34  ;;  %v2998_v1 = vadd.f32 %v2934_v17, %v169_v54  ;;  %v222_v32 = vld [vmem:[%s4281_s5 + $0xd0] sm:$0xff]  ;;  %v211_v54 = vld [vmem:[%s4281_s5 + $0x78] sm:$0xff] }
  0xd0   :  { %400 = vmatpush1.msra.mxu0 %v250_v38  ;;  %358 = vmatprep.mubr.f32.mxu0 %v4294_v7  ;;  %v2259_v8 = vpop.f32.mrf.mxu1  ;;  %v219_v38 = vld [vmem:[%s4281_s5 + $0xb8] sm:$0xff] }
  0xd1   :  { %401 = vmatprep.subr.mxu0 %v247_v40  ;;  %v192_v9 = vmax.f32 %v2998_v1, 0.0  ;;  %v193_v40 = vmax.f32 %v3016_v21, 0.0  ;;  %v3227_v1 = vld [vmem:[%s4282_s7 + $0xb0] sm:$0xff] }
  0xd2   :  { %402 = vmatpush1.msra.mxu0 %v246_v44  ;;  %v179_v28 = vpop.f32.mrf.mxu1  ;;  %v218_v44 = vld [vmem:[%s4281_s5 + $0xb0] sm:$0xff]  ;;  %4412 = vst [vmem:[#allocation18_spill] sm:$0xff] %v3227_v1 }
  0xd3   :  { %403 = vmatprep.subr.mxu0 %v243_v46  ;;  %359 = vmatmul.mubr.f32.gmra.mxu0 %v190_v50  ;;  %v3036_v42 = vadd.f32 %v2934_v17, %v179_v28  ;;  %v215_v46 = vld [vmem:[%s4281_s5 + $0x98] sm:$0xff]  ;;  %v3254_v21 = vld [vmem:[%s4282_s7 + $0x70] sm:$0xff] }
  0xd4   :  { %404 = vmatpush1.msra.mxu0 %v242_v52  ;;  %364 = vmatprep.mubr.f32.mxu0 %v4294_v7  ;;  %v214_v52 = vld [vmem:[%s4281_s5 + $0x90] sm:$0xff]  ;;  %v3088_v28 = vld [vmem:[%s4282_s7 + $0x1f8] sm:$0xff]  ;;  %4416 = vst [vmem:[#allocation22_spill] sm:$0xff] %v3254_v21 }
  0xd5   :  { %405 = vmatprep.subr.mxu0 %v239_v56  ;;  %v3054_v56 = vadd.f32 %v2259_v8, %v2934_v17  ;;  %v206_v17 = vld [vmem:[%s4281_s5 + $0x50] sm:$0xff]  ;;  %4410 = vst [vmem:[#allocation16_spill] sm:$0xff] %v3088_v28 }
  0xd6   :  { %406 = vmatpush1.msra.mxu0 %v238_v59  ;;  %v194_v59 = vmax.f32 %v3036_v42, 0.0  ;;  %v3281_v42 = vld [vmem:[%s4282_s7 + $0x30] sm:$0xff] }
  0xd7   :  { %407 = vmatprep.subr.mxu0 %v235_v61  ;;  %365 = vmatmul.mubr.f32.gmra.mxu0 %v191_v63  ;;  %v210_v61 = vld [vmem:[%s4281_s5 + $0x70] sm:$0xff]  ;;  %v4292_v8 = vmax.f32 %v3054_v56, 0.0  ;;  %4420 = vst [vmem:[#allocation26_spill] sm:$0xff] %v3281_v42 }
  0xd8   :  { %408 = vmatpush1.msra.mxu0 %v234_v3  ;;  %370 = vmatprep.mubr.f32.mxu0 %v4294_v7  ;;  %v207_v3 = vld [vmem:[%s4281_s5 + $0x58] sm:$0xff] }
  0xd9   :  { %409 = vmatprep.subr.mxu0 %v231_v5  ;;  %v203_v5 = vld [vmem:[%s4281_s5 + $0x38] sm:$0xff] }
  0xda   :  { %410 = vmatpush1.msra.mxu0 %v230_v15  ;;  %v202_v15 = vld [vmem:[%s4281_s5 + $0x30] sm:$0xff] }
  0xdb   :  { %411 = vmatprep.subr.mxu0 %v227_v18  ;;  %371 = vmatmul.mubr.f32.gmra.mxu0 %v192_v9  ;;  %v199_v18 = vld [vmem:[%s4281_s5 + $0x18] sm:$0xff] }
  0xdc   :  { %412 = vmatpush1.msra.mxu0 %v226_v26  ;;  %376 = vmatprep.mubr.f32.mxu0 %v4294_v7  ;;  %v198_v26 = vld [vmem:[%s4281_s5 + $0x10] sm:$0xff] }
  0xdd   :  { %413 = vmatprep.subr.mxu0 %v223_v30  ;;  %v3093_v30 = vld [vmem:[%s4282_s7 + $0x1f0] sm:$0xff] }
  0xde   :  { %414 = vmatpush1.msra.mxu0 %v222_v32  ;;  %v3098_v32 = vld [vmem:[%s4282_s7 + $0x1d8] sm:$0xff] }
  0xdf   :  { %415 = vmatprep.subr.mxu0 %v219_v38  ;;  %377 = vmatmul.mubr.f32.gmra.mxu0 %v193_v40  ;;  %v3106_v38 = vld [vmem:[%s4282_s7 + $0x1d0] sm:$0xff] }
  0xe0   :  { %416 = vmatpush1.msra.mxu0 %v218_v44  ;;  %382 = vmatprep.mubr.f32.mxu0 %v4294_v7  ;;  %v3113_v44 = vld [vmem:[%s4282_s7 + $0x1b8] sm:$0xff] }
  0xe1   :  { %417 = vmatprep.subr.mxu0 %v215_v46  ;;  %v3133_v46 = vld [vmem:[%s4282_s7 + $0x190] sm:$0xff] }
  0xe2   :  { %418 = vmatpush1.msra.mxu0 %v214_v52  ;;  %v3140_v52 = vld [vmem:[%s4282_s7 + $0x178] sm:$0xff] }
  0xe3   :  { %419 = vmatprep.subr.mxu0 %v211_v54  ;;  %383 = vmatmul.mubr.f32.gmra.mxu0 %v194_v59  ;;  %v3160_v54 = vld [vmem:[%s4282_s7 + $0x150] sm:$0xff] }
  0xe4   :  { %420 = vmatpush1.msra.mxu0 %v210_v61  ;;  %388 = vmatprep.mubr.f32.mxu0 %v4294_v7  ;;  %v3167_v61 = vld [vmem:[%s4282_s7 + $0x138] sm:$0xff] }
  0xe5   :  { %421 = vmatprep.subr.mxu0 %v207_v3  ;;  %v3187_v3 = vld [vmem:[%s4282_s7 + $0x110] sm:$0xff] }
  0xe6   :  { %422 = vmatpush1.msra.mxu0 %v206_v17  ;;  %v3194_v17 = vld [vmem:[%s4282_s7 + $0xf8] sm:$0xff] }
  0xe7   :  { %423 = vmatprep.subr.mxu0 %v203_v5  ;;  %389 = vmatmul.mubr.f32.gmra.mxu0 %v4292_v8  ;;  %v3214_v5 = vld [vmem:[%s4282_s7 + $0xd0] sm:$0xff] }
  0xe8   :  { %424 = vmatpush1.msra.mxu0 %v202_v15  ;;  %459 = vmatprep.mubr.f32.mxu0 %v4294_v7  ;;  %v3221_v15 = vld [vmem:[%s4282_s7 + $0xb8] sm:$0xff]  ;;  %v3268_v8 = vld [vmem:[%s4282_s7 + $0x50] sm:$0xff] }
  0xe9   :  { %425 = vmatprep.subr.mxu0 %v199_v18  ;;  %4411 = vst [vmem:[#allocation17_spill] sm:$0xff] %v3221_v15  ;;  %v3241_v18 = vld [vmem:[%s4282_s7 + $0x90] sm:$0xff]  ;;  %4418 = vst [vmem:[#allocation24_spill] sm:$0xff] %v3268_v8 }
  0xea   :  { %426 = vmatpush1.msra.mxu0 %v198_v26  ;;  %4414 = vst [vmem:[#allocation20_spill] sm:$0xff] %v3241_v18  ;;  %v3248_v26 = vld [vmem:[%s4282_s7 + $0x78] sm:$0xff] }
  0xeb   :  { %681 = vmatprep.subr.mxu0 %v3088_v28  ;;  %460 = vmatmul.mubr.f32.vlgmr.msra.gmra.mxu0 %v188_v25  ;;  %v3125_v25 = vld [vmem:[%s4282_s7 + $0x198] sm:$0xff]  ;;  %4415 = vst [vmem:[#allocation21_spill] sm:$0xff] %v3248_v26 }
  0xec   :  { %682 = vmatpush1.msra.mxu0 %v3093_v30  ;;  %465 = vmatprep.mubr.f32.mxu0 %v4294_v7 }
  0xed   :  { %683 = vmatprep.subr.mxu0 %v3098_v32 }
  0xee   :  { %684 = vmatpush1.msra.mxu0 %v3106_v38 }
  0xef   :  { %685 = vmatprep.subr.mxu0 %v3113_v44  ;;  %466 = vmatmul.mubr.f32.gmra.mxu0 %v189_v34  ;;  %v3152_v34 = vld [vmem:[%s4282_s7 + $0x158] sm:$0xff] }
  0xf0   :  { %686 = vmatpush1.msra.mxu0 %v3119_v19  ;;  %471 = vmatprep.mubr.f32.mxu0 %v4294_v7 }
  0xf1   :  { %687 = vmatprep.subr.mxu0 %v3125_v25 }
  0xf2   :  { %688 = vmatpush1.msra.mxu0 %v3133_v46 }
  0xf3   :  { %689 = vmatprep.subr.mxu0 %v3140_v52  ;;  %472 = vmatmul.mubr.f32.gmra.mxu0 %v190_v50  ;;  %v3179_v50 = vld [vmem:[%s4282_s7 + $0x118] sm:$0xff] }
  0xf4   :  { %690 = vmatpush1.msra.mxu0 %v3146_v23  ;;  %477 = vmatprep.mubr.f32.mxu0 %v4294_v7 }
  0xf5   :  { %691 = vmatprep.subr.mxu0 %v3152_v34 }
  0xf6   :  { %692 = vmatpush1.msra.mxu0 %v3160_v54 }
  0xf7   :  { %693 = vmatprep.subr.mxu0 %v3167_v61  ;;  %478 = vmatmul.mubr.f32.gmra.mxu0 %v191_v63  ;;  %v3206_v63 = vld [vmem:[%s4282_s7 + $0xd8] sm:$0xff] }
  0xf8   :  { %694 = vmatpush1.msra.mxu0 %v3173_v36  ;;  %483 = vmatprep.mubr.f32.mxu0 %v4294_v7 }
  0xf9   :  { %695 = vmatprep.subr.mxu0 %v3179_v50 }
  0xfa   :  { %696 = vmatpush1.msra.mxu0 %v3187_v3 }
  0xfb   :  { %697 = vmatprep.subr.mxu0 %v3194_v17  ;;  %484 = vmatmul.mubr.f32.gmra.mxu0 %v192_v9  ;;  %v3233_v9 = vld [vmem:[%s4282_s7 + $0x98] sm:$0xff] }
  0xfc   :  { %698 = vmatpush1.msra.mxu0 %v3200_v48  ;;  %489 = vmatprep.mubr.f32.mxu0 %v4294_v7  ;;  %4413 = vst [vmem:[#allocation19_spill] sm:$0xff] %v3233_v9 }
  0xfd   :  { %699 = vmatprep.subr.mxu0 %v3206_v63 }
  0xfe   :  { %700 = vmatpush1.msra.mxu0 %v3214_v5 }
  0xff   :  { %701 = vmatprep.subr.mxu0 %v3221_v15  ;;  %490 = vmatmul.mubr.f32.gmra.mxu0 %v193_v40  ;;  %v3260_v40 = vld [vmem:[%s4282_s7 + $0x58] sm:$0xff] }
 0x100   :  { %702 = vmatpush1.msra.mxu0 %v3227_v1  ;;  %495 = vmatprep.mubr.f32.mxu0 %v4294_v7  ;;  %4417 = vst [vmem:[#allocation23_spill] sm:$0xff] %v3260_v40 }
 0x101   :  { %703 = vmatprep.subr.mxu0 %v3233_v9 }
 0x102   :  { %704 = vmatpush1.msra.mxu0 %v3241_v18 }
 0x103   :  { %705 = vmatprep.subr.mxu0 %v3248_v26  ;;  %496 = vmatmul.mubr.f32.gmra.mxu0 %v194_v59  ;;  %v3287_v59 = vld [vmem:[%s4282_s7 + $0x18] sm:$0xff] }
 0x104   :  { %706 = vmatpush1.msra.mxu0 %v3254_v21  ;;  %501 = vmatprep.mubr.f32.mxu0 %v4294_v7  ;;  %4421 = vst [vmem:[#allocation27_spill] sm:$0xff] %v3287_v59  ;;  %v4422_v7 = vmax.f32 %v3054_v56, 0.0 }
 0x105   :  { %707 = vmatprep.subr.mxu0 %v3260_v40 }
 0x106   :  { %708 = vmatpush1.msra.mxu0 %v3268_v8 }
 0x107   :  { %709 = vmatprep.subr.mxu0 %v3275_v11  ;;  %502 = vmatmul.mubr.f32.gmra.mxu0 %v4422_v7  ;;  %v262_v7 = vlaneseq }
 0x108   :  { %710 = vmatpush1.msra.mxu0 %v3281_v42  ;;  %745 = vmatprep.mubr.f32.mxu0 %v4424_v6 }
 0x109   :  { %711 = vmatprep.subr.mxu0 %v3287_v59 }
 0x10a   :  { %712 = vmatpush1.msra.mxu0 %v3295_v10 }
 0x10b   :  { %746 = vmatmul.mubr.f32.vlgmr.msra.gmra.mxu0 %v2893_v13  ;;  %857 = vmatprep.subr.mxu0 %v3088_v28  ;;  %v263_v13 = vshrl.u32 %v262_v7, 7 }
 0x10c   :  { %858 = vmatpush1.msra.mxu0 %v3093_v30  ;;  %921 = vmatprep.mubr.f32.mxu0 %v4424_v6  ;;  %v260_v6 = vld [vmem:[%s4285_s6] sm:$0xf] }
 0x10d   :  { %859 = vmatprep.subr.mxu0 %v3098_v32  ;;  %v264_v56 = vsub.s32 0, %v263_v13  ;;  %v268_v2 = vsub.s32 1, %v263_v13 }
 0x10e   :  { %860 = vmatpush1.msra.mxu0 %v3106_v38 }
 0x10f   :  { %861 = vmatprep.subr.mxu0 %v3113_v44  ;;  %v269_v0 = vrot.slane %v260_v6, %v268_v2 }
 0x110   :  { %862 = vmatpush1.msra.mxu0 %v3119_v19 }
 0x111   :  { %863 = vmatprep.subr.mxu0 %v3125_v25 }
 0x112   :  { %864 = vmatpush1.msra.mxu0 %v3133_v46 }
 0x113   :  { %865 = vmatprep.subr.mxu0 %v3140_v52 }
 0x114   :  { %866 = vmatpush1.msra.mxu0 %v3146_v23 }
 0x115   :  { %867 = vmatprep.subr.mxu0 %v3152_v34 }
 0x116   :  { %868 = vmatpush1.msra.mxu0 %v3160_v54 }
 0x117   :  { %869 = vmatprep.subr.mxu0 %v3167_v61 }
 0x118   :  { %870 = vmatpush1.msra.mxu0 %v3173_v36 }
 0x119   :  { %871 = vmatprep.subr.mxu0 %v3179_v50 }
 0x11a   :  { %872 = vmatpush1.msra.mxu0 %v3187_v3 }
 0x11b   :  { %873 = vmatprep.subr.mxu0 %v3194_v17 }
 0x11c   :  { %874 = vmatpush1.msra.mxu0 %v3200_v48 }
 0x11d   :  { %875 = vmatprep.subr.mxu0 %v3206_v63 }
 0x11e   :  { %876 = vmatpush1.msra.mxu0 %v3214_v5 }
 0x11f   :  { %877 = vmatprep.subr.mxu0 %v3221_v15 }
 0x120   :  { %878 = vmatpush1.msra.mxu0 %v3227_v1 }
 0x121   :  { %879 = vmatprep.subr.mxu0 %v3233_v9 }
 0x122   :  { %880 = vmatpush1.msra.mxu0 %v3241_v18 }
 0x123   :  { %881 = vmatprep.subr.mxu0 %v3248_v26 }
 0x124   :  { %882 = vmatpush1.msra.mxu0 %v3254_v21 }
 0x125   :  { %883 = vmatprep.subr.mxu0 %v3260_v40  ;;  %v265_v40 = vrot.slane %v260_v6, %v264_v56 }
 0x126   :  { %884 = vmatpush1.msra.mxu0 %v3268_v8 }
 0x127   :  { %885 = vmatprep.subr.mxu0 %v3275_v11 }
 0x128   :  { %886 = vmatpush1.msra.mxu0 %v3281_v42 }
 0x129   :  { %887 = vmatprep.subr.mxu0 %v3287_v59 }
 0x12a   :  { %888 = vmatpush1.msra.mxu0 %v3295_v10 }
 0x12b   :  { %1034 = vmatprep.subr.mxu0 %v3088_v28 }
 0x18b   :  { %v348_v4 = vpop.f32.mrf.mxu0 }
 0x18c   :  { %v349_v57 = vadd.f32 %v348_v4, %v265_v40 }
 0x18d   :  { %v350_v8 = vpop.f32.mrf.mxu0 }
 0x18f   :  { %v354_v11 = vpop.f32.mrf.mxu0 }
 0x190   :  { %v3339_v42 = vadd.f32 %v354_v11, %v265_v40 }
 0x191   :  { %v356_v59 = vpop.f32.mrf.mxu0 }
 0x192   :  { %4425 = vst [vmem:[#allocation29_spill] sm:$0xff] %v3339_v42  ;;  %v3341_v21 = vadd.f32 %v356_v59, %v269_v0  ;;  %v676_v42 = vpop.f32.mrf.mxu1 }
 0x193   :  { %v360_v10 = vpop.f32.mrf.mxu0 }
 0x194   :  { %4426 = vst [vmem:[#allocation30_spill] sm:$0xff] %v3341_v21  ;;  %v3343_v28 = vadd.f32 %v360_v10, %v265_v40 }
 0x195   :  { %v362_v7 = vpop.f32.mrf.mxu0 }
 0x196   :  { %4427 = vst [vmem:[#allocation31_spill] sm:$0xff] %v3343_v28  ;;  %v3345_v62 = vadd.f32 %v362_v7, %v269_v0 }
 0x197   :  { %v366_v26 = vpop.f32.mrf.mxu0 }
 0x198   :  { %4428 = vst [vmem:[#allocation32_spill] sm:$0xff] %v3345_v62  ;;  %v3347_v60 = vadd.f32 %v366_v26, %v265_v40 }
 0x199   :  { %v368_v18 = vpop.f32.mrf.mxu0 }
 0x19a   :  { %4429 = vst [vmem:[#allocation33_spill] sm:$0xff] %v3347_v60  ;;  %v3349_v58 = vadd.f32 %v368_v18, %v269_v0 }
 0x19b   :  { %v372_v56 = vpop.f32.mrf.mxu0 }
 0x19c   :  { %4430 = vst [vmem:[#allocation34_spill] sm:$0xff] %v3349_v58  ;;  %v3351_v9 = vadd.f32 %v372_v56, %v265_v40 }
 0x19d   :  { %v374_v2 = vpop.f32.mrf.mxu0 }
 0x19e   :  { %4431 = vst [vmem:[#allocation35_spill] sm:$0xff] %v3351_v9  ;;  %v3353_v11 = vadd.f32 %v374_v2, %v269_v0  ;;  %v272_v2 = vsub.s32 2, %v263_v13 }
 0x19f   :  { %v378_v59 = vpop.f32.mrf.mxu0 }
 0x1a0   :  { %4432 = vst [vmem:[#allocation36_spill] sm:$0xff] %v3353_v11  ;;  %v3355_v21 = vadd.f32 %v378_v59, %v265_v40  ;;  %v276_v59 = vsub.s32 3, %v263_v13 }
 0x1a1   :  { %v380_v10 = vpop.f32.mrf.mxu0 }
 0x1a2   :  { %4433 = vst [vmem:[#allocation37_spill] sm:$0xff] %v3355_v21  ;;  %v3357_v28 = vadd.f32 %v380_v10, %v269_v0  ;;  %v273_v10 = vrot.slane %v260_v6, %v272_v2 }
 0x1a3   :  { %v384_v7 = vpop.f32.mrf.mxu0 }
 0x1a4   :  { %4434 = vst [vmem:[#allocation38_spill] sm:$0xff] %v3357_v28  ;;  %v3359_v62 = vadd.f32 %v384_v7, %v265_v40  ;;  %v351_v28 = vadd.f32 %v350_v8, %v269_v0  ;;  %v678_v7 = vpop.f32.mrf.mxu1 }
 0x1a5   :  { %v386_v26 = vpop.f32.mrf.mxu0 }
 0x1a6   :  { %4435 = vst [vmem:[#allocation39_spill] sm:$0xff] %v3359_v62  ;;  %v3361_v60 = vadd.f32 %v386_v26, %v269_v0  ;;  %v277_v62 = vrot.slane %v260_v6, %v276_v59 }
 0x1a7   :  { %v390_v18 = vpop.f32.mrf.mxu0 }
 0x1a8   :  { %4436 = vst [vmem:[#allocation40_spill] sm:$0xff] %v3361_v60  ;;  %v3363_v58 = vadd.f32 %v390_v18, %v265_v40  ;;  %v752_v60 = vadd.f32 %v676_v42, %v349_v57 }
 0x1a9   :  { %v392_v56 = vpop.f32.mrf.mxu0 }
 0x1aa   :  { %4437 = vst [vmem:[#allocation41_spill] sm:$0xff] %v3363_v58  ;;  %v3365_v9 = vadd.f32 %v392_v56, %v269_v0  ;;  %v753_v58 = vadd.f32 %v678_v7, %v351_v28  ;;  %v2188_v53 = vmul.f32 -1.442695, %v752_v60 }
 0x1ab   :  { %v461_v11 = vpop.f32.mrf.mxu0 }
 0x1ac   :  { %4438 = vst [vmem:[#allocation42_spill] sm:$0xff] %v3365_v9  ;;  %v2189_v4 = vmul.f32 -1.442695, %v753_v58  ;;  %2305 = vpow2.f32 %v2188_v53 }
 0x1ad   :  { %v463_v21 = vpop.f32.mrf.mxu0 }
 0x1ae   :  { %2307 = vpow2.f32 %v2189_v4 }
 0x1af   :  { %v467_v1 = vpop.f32.mrf.mxu0 }
 0x1b0   :  { %v3367_v55 = vadd.f32 %v467_v1, %v273_v10 }
 0x1b1   :  { %v469_v26 = vpop.f32.mrf.mxu0 }
 0x1b2   :  { %v3369_v18 = vadd.f32 %v469_v26, %v277_v62 }
 0x1b3   :  { %v473_v56 = vpop.f32.mrf.mxu0 }
 0x1b4   :  { %v3371_v9 = vadd.f32 %v473_v56, %v273_v10 }
 0x1b5   :  { %v475_v15 = vpop.f32.mrf.mxu0 }
 0x1b6   :  { %v3373_v13 = vadd.f32 %v475_v15, %v277_v62 }
 0x1b7   :  { %v479_v40 = vpop.f32.mrf.mxu0 }
 0x1b8   :  { %v3375_v0 = vadd.f32 %v479_v40, %v273_v10 }
 0x1b9   :  { %v481_v8 = vpop.f32.mrf.mxu0  ;;  %v2306_v56 = vpop.eup %2305 }
 0x1ba   :  { %4439 = vst [vmem:[#allocation43_spill] sm:$0xff] %v3375_v0  ;;  %v3377_v6 = vadd.f32 %v481_v8, %v277_v62  ;;  %v3673_v0 = vld [vmem:[%s4282_s7 + $0x40] sm:$0xff] }
 0x1bb   :  { %v485_v57 = vpop.f32.mrf.mxu0  ;;  %v2308_v40 = vpop.eup %2307 }
 0x1bc   :  { %4440 = vst [vmem:[#allocation44_spill] sm:$0xff] %v3377_v6  ;;  %v3379_v1 = vadd.f32 %v485_v57, %v273_v10 }
 0x1bd   :  { %v487_v28 = vpop.f32.mrf.mxu0 }
 0x1be   :  { %4441 = vst [vmem:[#allocation45_spill] sm:$0xff] %v3379_v1  ;;  %v3381_v42 = vadd.f32 %v487_v28, %v277_v62  ;;  %v765_v28 = vadd.f32 1.0, %v2306_v56  ;;  %v605_v56 = vld [vmem:[%s4286_s2] sm:$0xff] }
 0x1bf   :  { %v491_v2 = vpop.f32.mrf.mxu0 }
 0x1c0   :  { %4442 = vst [vmem:[#allocation46_spill] sm:$0xff] %v3381_v42  ;;  %v3383_v59 = vadd.f32 %v491_v2, %v273_v10  ;;  %v462_v42 = vadd.f32 %v461_v11, %v273_v10  ;;  %v766_v2 = vadd.f32 1.0, %v2308_v40  ;;  %2309 = vrcp.f32 %v765_v28 }
 0x1c1   :  { %v493_v60 = vpop.f32.mrf.mxu0  ;;  %v4473_v28 = vmov 0.0  }
 0x1c2   :  { %4443 = vst [vmem:[#allocation47_spill] sm:$0xff] %v3383_v59  ;;  %v3385_v15 = vadd.f32 %v493_v60, %v277_v62  ;;  %v464_v60 = vadd.f32 %v463_v21, %v277_v62  ;;  %2311 = vrcp.f32 %v766_v2  ;;  %v4474_v2 = vld [vmem:[#allocation28_spill] sm:$0xff] }
 0x1c3   :  { %v497_v58 = vpop.f32.mrf.mxu0 }
 0x1c4   :  { %4444 = vst [vmem:[#allocation48_spill] sm:$0xff] %v3385_v15  ;;  %v3387_v7 = vadd.f32 %v497_v58, %v273_v10 }
 0x1c5   :  { %v499_v26 = vpop.f32.mrf.mxu0 }
 0x1c6   :  { %4445 = vst [vmem:[#allocation49_spill] sm:$0xff] %v3387_v7  ;;  %v3389_v53 = vadd.f32 %v499_v26, %v277_v62 }
 0x1c7   :  { %v503_v4 = vpop.f32.mrf.mxu0 }
 0x1c8   :  { %4446 = vst [vmem:[#allocation50_spill] sm:$0xff] %v3389_v53  ;;  %v3391_v8 = vadd.f32 %v503_v4, %v273_v10 }
 0x1c9   :  { %v505_v57 = vpop.f32.mrf.mxu0 }
 0x1ca   :  { %4447 = vst [vmem:[#allocation51_spill] sm:$0xff] %v3391_v8  ;;  %v3393_v1 = vadd.f32 %v505_v57, %v277_v62  ;;  %v3652_v8 = vld [vmem:[%s4282_s7 + $0x68] sm:$0xff] }
 0x1cb   :  { %v747_v59 = vpop.f32.mrf.mxu0 }
 0x1cc   :  { %4448 = vst [vmem:[#allocation52_spill] sm:$0xff] %v3393_v1  ;;  %v754_v15 = vadd.f32 %v747_v59, %v462_v42  ;;  %v4469_v59 = vld [vmem:[#allocation26_spill] sm:$0xff]  ;;  %v3645_v1 = vld [vmem:[%s4282_s7 + $0x80] sm:$0xff] }
 0x1cd   :  { %v749_v6 = vpop.f32.mrf.mxu0  ;;  %v2310_v26 = vpop.eup %2309 }
 0x1ce   :  { %v2190_v58 = vmul.f32 -1.442695, %v754_v15  ;;  %v755_v7 = vadd.f32 %v749_v6, %v464_v60  ;;  %v4470_v15 = vld [vmem:[#allocation14_spill] sm:$0xff]  ;;  %v3472_v60 = vld [vmem:[%s4282_s7 + $0x1e8] sm:$0xff] }
 0x1cf   :  { %v2312_v53 = vpop.eup %2311 }
 0x1d0   :  { %2313 = vpow2.f32 %v2190_v58  ;;  %v775_v40 = vmul.f32 %v2312_v53, %v605_v56  ;;  %v4472_v53 = vld [vmem:[#allocation15_spill] sm:$0xff]  ;;  %v4476_v58 = vld [vmem:[#allocation16_spill] sm:$0xff]  ;;  %v4477_v56 = vld [vmem:[#allocation29_spill] sm:$0xff] }
 0x1d1   :  { %2315 = vtanh.f32 %v755_v7  ;;  %v4471_v7 = vld [vmem:[#allocation27_spill] sm:$0xff] }
 0x1dd   :  { %v2314_v11 = vpop.eup %2313 }
 0x1de   :  { %v2316_v10 = vpop.eup %2315  ;;  %v767_v4 = vadd.f32 1.0, %v2314_v11 }
 0x1df   :  { %v776_v57 = vmul.f32 %v2316_v10, %v2310_v26 }
 0x1e0   :  { %2317 = vrcp.f32 %v767_v4 }
 0x1e1   :  { %v3398_v62 = vadd.f32 %v776_v57, %v775_v40  ;;  %v4478_v40 = vld [vmem:[#allocation30_spill] sm:$0xff] }
 0x1e3   :  { %2319 = vtanh.f32 %v3398_v62 }
 0x1ed   :  { %v2318_v21 = vpop.eup %2317 }
 0x1f0   :  { %v2320_v6 = vpop.eup %2319 }
 0x1f1   :  { %v3401_v42 = vmul.f32 %v2320_v6, %v2318_v21 }
 0x1f3   :  { %4449 = vst [vmem:[#allocation53_spill] sm:$0xff] %v3401_v42  ;;  %851 = vmatmul.mubr.f32.vlgmr.msra.gmra.mxu1 %v3401_v42  ;;  %922 = vmatmul.mubr.f32.vlgmr.msra.gmra.mxu0 %v3401_v42  ;;  %v3666_v42 = vld [vmem:[%s4282_s7 + $0x48] sm:$0xff] }
 0x1f4   :  { %964 = vmatpush1.msra.mxu1 %v2608_v12  ;;  %1035 = vmatpush1.msra.mxu0 %v3093_v30  ;;  %v4450_v12 = vld [vmem:[#allocation4_spill] sm:$0xff] }
 0x1f5   :  { %965 = vmatprep.subr.mxu1 %v2617_v14  ;;  %1036 = vmatprep.subr.mxu0 %v3098_v32  ;;  %v4451_v14 = vld [vmem:[#allocation17_spill] sm:$0xff]  ;;  %4475 = vst [vmem:[#allocation4_spill] sm:$0xff] %v3472_v60 }
 0x1f6   :  { %966 = vmatpush1.msra.mxu1 %v2626_v16  ;;  %1037 = vmatpush1.msra.mxu0 %v3106_v38  ;;  %v4452_v16 = vld [vmem:[#allocation5_spill] sm:$0xff] }
 0x1f7   :  { %967 = vmatprep.subr.mxu1 %v2642_v20  ;;  %1038 = vmatprep.subr.mxu0 %v3113_v44  ;;  %v4453_v20 = vld [vmem:[#allocation18_spill] sm:$0xff]  ;;  %4480 = vst [vmem:[#allocation5_spill] sm:$0xff] %v3652_v8 }
 0x1f8   :  { %968 = vmatpush1.msra.mxu1 %v2651_v22  ;;  %1039 = vmatpush1.msra.mxu0 %v3119_v19  ;;  %v4454_v22 = vld [vmem:[#allocation6_spill] sm:$0xff] }
 0x1f9   :  { %969 = vmatprep.subr.mxu1 %v2660_v24  ;;  %1040 = vmatprep.subr.mxu0 %v3125_v25  ;;  %v4455_v24 = vld [vmem:[#allocation19_spill] sm:$0xff]  ;;  %4482 = vst [vmem:[#allocation6_spill] sm:$0xff] %v3666_v42 }
 0x1fa   :  { %970 = vmatpush1.msra.mxu1 %v2674_v27  ;;  %1041 = vmatpush1.msra.mxu0 %v3133_v46  ;;  %v4456_v27 = vld [vmem:[#allocation7_spill] sm:$0xff]  ;;  %4483 = vst [vmem:[#allocation19_spill] sm:$0xff] %v3673_v0 }
 0x1fb   :  { %971 = vmatprep.subr.mxu1 %v2683_v29  ;;  %1042 = vmatprep.subr.mxu0 %v3140_v52  ;;  %v4457_v29 = vld [vmem:[#allocation20_spill] sm:$0xff] }
 0x1fc   :  { %972 = vmatpush1.msra.mxu1 %v2692_v31  ;;  %1043 = vmatpush1.msra.mxu0 %v3146_v23  ;;  %v4458_v31 = vld [vmem:[#allocation8_spill] sm:$0xff] }
 0x1fd   :  { %973 = vmatprep.subr.mxu1 %v2701_v33  ;;  %1044 = vmatprep.subr.mxu0 %v3152_v34  ;;  %v4459_v33 = vld [vmem:[#allocation21_spill] sm:$0xff] }
 0x1fe   :  { %974 = vmatpush1.msra.mxu1 %v2710_v35  ;;  %1045 = vmatpush1.msra.mxu0 %v3160_v54  ;;  %v4460_v35 = vld [vmem:[#allocation9_spill] sm:$0xff] }
 0x1ff   :  { %975 = vmatprep.subr.mxu1 %v2719_v37  ;;  %1046 = vmatprep.subr.mxu0 %v3167_v61  ;;  %v4461_v37 = vld [vmem:[#allocation22_spill] sm:$0xff] }
 0x200   :  { %976 = vmatpush1.msra.mxu1 %v2728_v39  ;;  %1047 = vmatpush1.msra.mxu0 %v3173_v36  ;;  %v4462_v39 = vld [vmem:[#allocation10_spill] sm:$0xff] }
 0x201   :  { %977 = vmatprep.subr.mxu1 %v2737_v41  ;;  %1048 = vmatprep.subr.mxu0 %v3179_v50  ;;  %v4463_v41 = vld [vmem:[#allocation23_spill] sm:$0xff] }
 0x202   :  { %978 = vmatpush1.msra.mxu1 %v2746_v43  ;;  %1049 = vmatpush1.msra.mxu0 %v3187_v3  ;;  %v4464_v43 = vld [vmem:[#allocation11_spill] sm:$0xff] }
 0x203   :  { %979 = vmatprep.subr.mxu1 %v2755_v45  ;;  %1050 = vmatprep.subr.mxu0 %v3194_v17  ;;  %v4465_v45 = vld [vmem:[#allocation24_spill] sm:$0xff] }
 0x204   :  { %980 = vmatpush1.msra.mxu1 %v2764_v47  ;;  %1051 = vmatpush1.msra.mxu0 %v3200_v48  ;;  %v4466_v47 = vld [vmem:[#allocation12_spill] sm:$0xff] }
 0x205   :  { %981 = vmatprep.subr.mxu1 %v2773_v49  ;;  %1052 = vmatprep.subr.mxu0 %v3206_v63  ;;  %v4467_v49 = vld [vmem:[#allocation25_spill] sm:$0xff] }
 0x206   :  { %982 = vmatpush1.msra.mxu1 %v2782_v51  ;;  %1053 = vmatpush1.msra.mxu0 %v3214_v5  ;;  %v4468_v51 = vld [vmem:[#allocation13_spill] sm:$0xff] }
 0x207   :  { %983 = vmatprep.subr.mxu1 %v4450_v12  ;;  %1054 = vmatprep.subr.mxu0 %v4451_v14 }
 0x208   :  { %984 = vmatpush1.msra.mxu1 %v4452_v16  ;;  %1055 = vmatpush1.msra.mxu0 %v4453_v20 }
 0x209   :  { %985 = vmatprep.subr.mxu1 %v4454_v22  ;;  %1056 = vmatprep.subr.mxu0 %v4455_v24 }
 0x20a   :  { %986 = vmatpush1.msra.mxu1 %v4456_v27  ;;  %1057 = vmatpush1.msra.mxu0 %v4457_v29 }
 0x20b   :  { %987 = vmatprep.subr.mxu1 %v4458_v31  ;;  %1058 = vmatprep.subr.mxu0 %v4459_v33 }
 0x20c   :  { %988 = vmatpush1.msra.mxu1 %v4460_v35  ;;  %1059 = vmatpush1.msra.mxu0 %v4461_v37 }
 0x20d   :  { %989 = vmatprep.subr.mxu1 %v4462_v39  ;;  %1060 = vmatprep.subr.mxu0 %v4463_v41 }
 0x20e   :  { %990 = vmatpush1.msra.mxu1 %v4464_v43  ;;  %1061 = vmatpush1.msra.mxu0 %v4465_v45 }
 0x20f   :  { %991 = vmatprep.subr.mxu1 %v4466_v47  ;;  %1062 = vmatprep.subr.mxu0 %v4467_v49 }
 0x210   :  { %992 = vmatpush1.msra.mxu1 %v4468_v51  ;;  %1063 = vmatpush1.msra.mxu0 %v4469_v59 }
 0x211   :  { %993 = vmatprep.subr.mxu1 %v4470_v15  ;;  %1064 = vmatprep.subr.mxu0 %v4471_v7 }
 0x212   :  { %994 = vmatpush1.msra.mxu1 %v4472_v53  ;;  %1027 = vmatprep.mubr.f32.mxu1 %v4473_v28 }
 0x213   :  { %1065 = vmatpush1.msra.mxu0 %v4474_v2  ;;  %1098 = vmatprep.mubr.f32.mxu0 %v4473_v28 }
 0x214   :  { %1140 = vmatprep.subr.mxu1 %v3472_v60  ;;  %1211 = vmatprep.subr.mxu0 %v4476_v58 }
 0x2b3   :  { %v852_v26 = vpop.f32.mrf.mxu1  ;;  %v923_v6 = vpop.f32.mrf.mxu0 }
 0x2b4   :  { %v928_v11 = vadd.f32 %v852_v26, %v4477_v56  ;;  %v930_v12 = vadd.f32 %v923_v6, %v3367_v55  ;;  %v3519_v6 = vld [vmem:[%s4282_s7 + $0x1a0] sm:$0xff] }
 0x2b5   :  { %v854_v10 = vpop.f32.mrf.mxu1  ;;  %v925_v16 = vpop.f32.mrf.mxu0 }
 0x2b6   :  { %v2191_v4 = vmul.f32 -1.442695, %v928_v11  ;;  %v929_v57 = vadd.f32 %v854_v10, %v4478_v40  ;;  %v2193_v22 = vmul.f32 -1.442695, %v930_v12  ;;  %v931_v27 = vadd.f32 %v925_v16, %v3369_v18  ;;  %v3491_v40 = vld [vmem:[%s4282_s7 + $0x1e0] sm:$0xff]  ;;  %v3526_v12 = vld [vmem:[%s4282_s7 + $0x188] sm:$0xff] }
 0x2b7   :  { %v3533_v16 = vld [vmem:[%s4282_s7 + $0x180] sm:$0xff] }
 0x2b8   :  { %2321 = vpow2.f32 %v2191_v4  ;;  %v2192_v21 = vmul.f32 -1.442695, %v929_v57  ;;  %v3505_v57 = vld [vmem:[%s4282_s7 + $0x1c0] sm:$0xff] }
 0x2ba   :  { %2323 = vpow2.f32 %v2192_v21  ;;  %v3512_v21 = vld [vmem:[%s4282_s7 + $0x1a8] sm:$0xff] }
 0x2bb   :  { %2325 = vpow2.f32 %v2193_v22  ;;  %v3540_v22 = vld [vmem:[%s4282_s7 + $0x168] sm:$0xff] }
 0x2bc   :  { %2327 = vtanh.f32 %v931_v27  ;;  %v3547_v27 = vld [vmem:[%s4282_s7 + $0x160] sm:$0xff] }
 0x2c5   :  { %v2322_v31 = vpop.eup %2321 }
 0x2c6   :  { %v941_v35 = vadd.f32 1.0, %v2322_v31  ;;  %v3554_v31 = vld [vmem:[%s4282_s7 + $0x148] sm:$0xff] }
 0x2c7   :  { %v2324_v39 = vpop.eup %2323 }
 0x2c8   :  { %2329 = vrcp.f32 %v941_v35  ;;  %v942_v43 = vadd.f32 1.0, %v2324_v39  ;;  %v2326_v47 = vpop.eup %2325  ;;  %v3561_v35 = vld [vmem:[%s4282_s7 + $0x140] sm:$0xff]  ;;  %v3568_v39 = vld [vmem:[%s4282_s7 + $0x128] sm:$0xff] }
 0x2c9   :  { %v2328_v51 = vpop.eup %2327  ;;  %v943_v56 = vadd.f32 1.0, %v2326_v47  ;;  %v3582_v47 = vld [vmem:[%s4282_s7 + $0x108] sm:$0xff] }
 0x2ca   :  { %2331 = vrcp.f32 %v942_v43  ;;  %v3575_v43 = vld [vmem:[%s4282_s7 + $0x120] sm:$0xff] }
 0x2cb   :  { %2333 = vrcp.f32 %v943_v56  ;;  %v3617_v56 = vld [vmem:[%s4282_s7 + $0xc0] sm:$0xff] }
 0x2d5   :  { %v2330_v15 = vpop.eup %2329 }
 0x2d6   :  { %v952_v53 = vmul.f32 %v2330_v15, %v2328_v51  ;;  %v3589_v51 = vld [vmem:[%s4282_s7 + $0x100] sm:$0xff]  ;;  %v3596_v15 = vld [vmem:[%s4282_s7 + $0xe8] sm:$0xff] }
 0x2d7   :  { %v2332_v26 = vpop.eup %2331 }
 0x2d8   :  { %v951_v55 = vmul.f32 %v2332_v26, %v3398_v62  ;;  %v2334_v18 = vpop.eup %2333  ;;  %v3498_v62 = vld [vmem:[%s4282_s7 + $0x1c8] sm:$0xff] }
 0x2d9   :  { %v3610_v26 = vld [vmem:[%s4282_s7 + $0xc8] sm:$0xff] }
 0x2da   :  { %v3481_v11 = vadd.f32 %v952_v53, %v951_v55  ;;  %v3603_v53 = vld [vmem:[%s4282_s7 + $0xe0] sm:$0xff]  ;;  %v3624_v55 = vld [vmem:[%s4282_s7 + $0xa8] sm:$0xff] }
 0x2dc   :  { %2335 = vtanh.f32 %v3481_v11 }
 0x2e9   :  { %v2336_v10 = vpop.eup %2335 }
 0x2ea   :  { %v3484_v4 = vmul.f32 %v2336_v10, %v2334_v18  ;;  %v3631_v18 = vld [vmem:[%s4282_s7 + $0xa0] sm:$0xff]  ;;  %v3638_v10 = vld [vmem:[%s4282_s7 + $0x88] sm:$0xff] }
 0x2ec   :  { %4479 = vst [vmem:[#allocation17_spill] sm:$0xff] %v3484_v4  ;;  %1028 = vmatmul.mubr.f32.vlgmr.msra.gmra.mxu1 %v3484_v4  ;;  %1099 = vmatmul.mubr.f32.vlgmr.msra.gmra.mxu0 %v3484_v4  ;;  %v3659_v4 = vld [vmem:[%s4282_s7 + $0x60] sm:$0xff] }
 0x2ed   :  { %1141 = vmatpush1.msra.mxu1 %v3491_v40  ;;  %1212 = vmatpush1.msra.mxu0 %v3093_v30  ;;  %4481 = vst [vmem:[#allocation18_spill] sm:$0xff] %v3659_v4 }
 0x2ee   :  { %1142 = vmatprep.subr.mxu1 %v3498_v62  ;;  %1213 = vmatprep.subr.mxu0 %v3098_v32 }
 0x2ef   :  { %1143 = vmatpush1.msra.mxu1 %v3505_v57  ;;  %1214 = vmatpush1.msra.mxu0 %v3106_v38 }
 0x2f0   :  { %1144 = vmatprep.subr.mxu1 %v3512_v21  ;;  %1215 = vmatprep.subr.mxu0 %v3113_v44 }
 0x2f1   :  { %1145 = vmatpush1.msra.mxu1 %v3519_v6  ;;  %1216 = vmatpush1.msra.mxu0 %v3119_v19 }
 0x2f2   :  { %1146 = vmatprep.subr.mxu1 %v3526_v12  ;;  %1217 = vmatprep.subr.mxu0 %v3125_v25 }
 0x2f3   :  { %1147 = vmatpush1.msra.mxu1 %v3533_v16  ;;  %1218 = vmatpush1.msra.mxu0 %v3133_v46 }
 0x2f4   :  { %1148 = vmatprep.subr.mxu1 %v3540_v22  ;;  %1219 = vmatprep.subr.mxu0 %v3140_v52 }
 0x2f5   :  { %1149 = vmatpush1.msra.mxu1 %v3547_v27  ;;  %1220 = vmatpush1.msra.mxu0 %v3146_v23 }
 0x2f6   :  { %1150 = vmatprep.subr.mxu1 %v3554_v31  ;;  %1221 = vmatprep.subr.mxu0 %v3152_v34 }
 0x2f7   :  { %1151 = vmatpush1.msra.mxu1 %v3561_v35  ;;  %1222 = vmatpush1.msra.mxu0 %v3160_v54 }
 0x2f8   :  { %1152 = vmatprep.subr.mxu1 %v3568_v39  ;;  %1223 = vmatprep.subr.mxu0 %v3167_v61 }
 0x2f9   :  { %1153 = vmatpush1.msra.mxu1 %v3575_v43  ;;  %1224 = vmatpush1.msra.mxu0 %v3173_v36 }
 0x2fa   :  { %1154 = vmatprep.subr.mxu1 %v3582_v47  ;;  %1225 = vmatprep.subr.mxu0 %v3179_v50 }
 0x2fb   :  { %1155 = vmatpush1.msra.mxu1 %v3589_v51  ;;  %1226 = vmatpush1.msra.mxu0 %v3187_v3 }
 0x2fc   :  { %1156 = vmatprep.subr.mxu1 %v3596_v15  ;;  %1227 = vmatprep.subr.mxu0 %v3194_v17 }
 0x2fd   :  { %1157 = vmatpush1.msra.mxu1 %v3603_v53  ;;  %1228 = vmatpush1.msra.mxu0 %v3200_v48 }
 0x2fe   :  { %1158 = vmatprep.subr.mxu1 %v3610_v26  ;;  %1229 = vmatprep.subr.mxu0 %v3206_v63 }
 0x2ff   :  { %1159 = vmatpush1.msra.mxu1 %v3617_v56  ;;  %1230 = vmatpush1.msra.mxu0 %v3214_v5 }
 0x300   :  { %1160 = vmatprep.subr.mxu1 %v3624_v55  ;;  %1231 = vmatprep.subr.mxu0 %v4451_v14 }
 0x301   :  { %1161 = vmatpush1.msra.mxu1 %v3631_v18  ;;  %1232 = vmatpush1.msra.mxu0 %v4453_v20 }
 0x302   :  { %1162 = vmatprep.subr.mxu1 %v3638_v10  ;;  %1233 = vmatprep.subr.mxu0 %v4455_v24 }
 0x303   :  { %1163 = vmatpush1.msra.mxu1 %v3645_v1  ;;  %1234 = vmatpush1.msra.mxu0 %v4457_v29 }
 0x304   :  { %1164 = vmatprep.subr.mxu1 %v3652_v8  ;;  %1235 = vmatprep.subr.mxu0 %v4459_v33 }
 0x305   :  { %1165 = vmatpush1.msra.mxu1 %v3659_v4  ;;  %1236 = vmatpush1.msra.mxu0 %v4461_v37  ;;  %v3680_v37 = vld [vmem:[%s4282_s7 + $0x28] sm:$0xff] }
 0x306   :  { %1166 = vmatprep.subr.mxu1 %v3666_v42  ;;  %1237 = vmatprep.subr.mxu0 %v4463_v41  ;;  %4484 = vst [vmem:[#allocation7_spill] sm:$0xff] %v3680_v37  ;;  %v3687_v41 = vld [vmem:[%s4282_s7 + $0x20] sm:$0xff] }
 0x307   :  { %1167 = vmatpush1.msra.mxu1 %v3673_v0  ;;  %1238 = vmatpush1.msra.mxu0 %v4465_v45  ;;  %4485 = vst [vmem:[#allocation8_spill] sm:$0xff] %v3687_v41  ;;  %v3694_v45 = vld [vmem:[%s4282_s7 + $0x8] sm:$0xff]  ;;  %v4489_v0 = vld [vmem:[#allocation32_spill] sm:$0xff] }
 0x308   :  { %1168 = vmatprep.subr.mxu1 %v3680_v37  ;;  %1239 = vmatprep.subr.mxu0 %v4467_v49  ;;  %4486 = vst [vmem:[#allocation9_spill] sm:$0xff] %v3694_v45  ;;  %v3701_v49 = vld [vmem:[%s4282_s7] sm:$0xff] }
 0x309   :  { %1169 = vmatpush1.msra.mxu1 %v3687_v41  ;;  %1240 = vmatpush1.msra.mxu0 %v4469_v59  ;;  %4487 = vst [vmem:[#allocation10_spill] sm:$0xff] %v3701_v49  ;;  %v4488_v59 = vld [vmem:[#allocation31_spill] sm:$0xff] }
 0x30a   :  { %1170 = vmatprep.subr.mxu1 %v3694_v45  ;;  %1241 = vmatprep.subr.mxu0 %v4471_v7 }
 0x30b   :  { %1171 = vmatpush1.msra.mxu1 %v3701_v49  ;;  %1204 = vmatprep.mubr.f32.mxu1 %v4473_v28 }
 0x30c   :  { %1242 = vmatpush1.msra.mxu0 %v4474_v2  ;;  %1275 = vmatprep.mubr.f32.mxu0 %v4473_v28 }
 0x30d   :  { %1317 = vmatprep.subr.mxu1 %v3472_v60  ;;  %1388 = vmatprep.subr.mxu0 %v4476_v58 }
 0x3ac   :  { %v1029_v45 = vpop.f32.mrf.mxu1  ;;  %v1100_v49 = vpop.f32.mrf.mxu0 }
 0x3ad   :  { %v1105_v7 = vadd.f32 %v1029_v45, %v4488_v59  ;;  %v1107_v33 = vadd.f32 %v1100_v49, %v3371_v9 }
 0x3ae   :  { %v1031_v41 = vpop.f32.mrf.mxu1  ;;  %v1102_v2 = vpop.f32.mrf.mxu0 }
 0x3af   :  { %v2194_v37 = vmul.f32 -1.442695, %v1105_v7  ;;  %v1106_v42 = vadd.f32 %v1031_v41, %v4489_v0  ;;  %v2196_v8 = vmul.f32 -1.442695, %v1107_v33  ;;  %v1108_v28 = vadd.f32 %v1102_v2, %v3373_v13 }
 0x3b1   :  { %2337 = vpow2.f32 %v2194_v37  ;;  %v2195_v4 = vmul.f32 -1.442695, %v1106_v42 }
 0x3b3   :  { %2339 = vpow2.f32 %v2195_v4 }
 0x3b4   :  { %2341 = vpow2.f32 %v2196_v8 }
 0x3b5   :  { %2343 = vtanh.f32 %v1108_v28 }
 0x3be   :  { %v2338_v60 = vpop.eup %2337 }
 0x3bf   :  { %v1118_v29 = vadd.f32 1.0, %v2338_v60  ;;  %v4512_v60 = vld [vmem:[#allocation34_spill] sm:$0xff] }
 0x3c0   :  { %v2340_v58 = vpop.eup %2339 }
 0x3c1   :  { %2345 = vrcp.f32 %v1118_v29  ;;  %v1119_v45 = vadd.f32 1.0, %v2340_v58  ;;  %v2342_v59 = vpop.eup %2341 }
 0x3c2   :  { %v2344_v0 = vpop.eup %2343  ;;  %v1120_v7 = vadd.f32 1.0, %v2342_v59 }
 0x3c3   :  { %2347 = vrcp.f32 %v1119_v45  ;;  %v4513_v45 = vld [vmem:[#allocation43_spill] sm:$0xff] }
 0x3c4   :  { %2349 = vrcp.f32 %v1120_v7 }
 0x3ce   :  { %v2346_v37 = vpop.eup %2345 }
 0x3cf   :  { %v1129_v42 = vmul.f32 %v2346_v37, %v2344_v0 }
 0x3d0   :  { %v2348_v41 = vpop.eup %2347 }
 0x3d1   :  { %v1128_v9 = vmul.f32 %v2348_v41, %v3481_v11  ;;  %v2350_v13 = vpop.eup %2349 }
 0x3d3   :  { %v3714_v49 = vadd.f32 %v1129_v42, %v1128_v9  ;;  %v4514_v42 = vld [vmem:[#allocation44_spill] sm:$0xff] }
 0x3d5   :  { %2351 = vtanh.f32 %v3714_v49 }
 0x3e2   :  { %v2352_v8 = vpop.eup %2351 }
 0x3e3   :  { %v3717_v33 = vmul.f32 %v2352_v8, %v2350_v13 }
 0x3e5   :  { %4490 = vst [vmem:[#allocation11_spill] sm:$0xff] %v3717_v33  ;;  %1205 = vmatmul.mubr.f32.vlgmr.msra.gmra.mxu1 %v3717_v33  ;;  %1276 = vmatmul.mubr.f32.vlgmr.msra.gmra.mxu0 %v3717_v33  ;;  %v4006_v33 = vld [vmem:[%s4282_s7 + $0x18] sm:$0xff] }
 0x3e6   :  { %1318 = vmatpush1.msra.mxu1 %v3491_v40  ;;  %1389 = vmatpush1.msra.mxu0 %v3093_v30  ;;  %v4491_v30 = vld [vmem:[#allocation20_spill] sm:$0xff] }
 0x3e7   :  { %1319 = vmatprep.subr.mxu1 %v3498_v62  ;;  %1390 = vmatprep.subr.mxu0 %v3098_v32  ;;  %v4492_v32 = vld [vmem:[#allocation5_spill] sm:$0xff]  ;;  %4523 = vst [vmem:[#allocation20_spill] sm:$0xff] %v4006_v33 }
 0x3e8   :  { %1320 = vmatpush1.msra.mxu1 %v3505_v57  ;;  %1391 = vmatpush1.msra.mxu0 %v3106_v38  ;;  %v4493_v38 = vld [vmem:[#allocation21_spill] sm:$0xff] }
 0x3e9   :  { %1321 = vmatprep.subr.mxu1 %v3512_v21  ;;  %1392 = vmatprep.subr.mxu0 %v3113_v44  ;;  %v4494_v44 = vld [vmem:[#allocation18_spill] sm:$0xff] }
 0x3ea   :  { %1322 = vmatpush1.msra.mxu1 %v3519_v6  ;;  %1393 = vmatpush1.msra.mxu0 %v3119_v19  ;;  %v4495_v19 = vld [vmem:[#allocation22_spill] sm:$0xff] }
 0x3eb   :  { %1323 = vmatprep.subr.mxu1 %v3526_v12  ;;  %1394 = vmatprep.subr.mxu0 %v3125_v25  ;;  %v4496_v25 = vld [vmem:[#allocation6_spill] sm:$0xff] }
 0x3ec   :  { %1324 = vmatpush1.msra.mxu1 %v3533_v16  ;;  %1395 = vmatpush1.msra.mxu0 %v3133_v46  ;;  %v4497_v46 = vld [vmem:[#allocation23_spill] sm:$0xff] }
 0x3ed   :  { %1325 = vmatprep.subr.mxu1 %v3540_v22  ;;  %1396 = vmatprep.subr.mxu0 %v3140_v52  ;;  %v4498_v52 = vld [vmem:[#allocation19_spill] sm:$0xff] }
 0x3ee   :  { %1326 = vmatpush1.msra.mxu1 %v3547_v27  ;;  %1397 = vmatpush1.msra.mxu0 %v3146_v23  ;;  %v4499_v23 = vld [vmem:[#allocation24_spill] sm:$0xff] }
 0x3ef   :  { %1327 = vmatprep.subr.mxu1 %v3554_v31  ;;  %1398 = vmatprep.subr.mxu0 %v3152_v34  ;;  %v4500_v34 = vld [vmem:[#allocation7_spill] sm:$0xff] }
 0x3f0   :  { %1328 = vmatpush1.msra.mxu1 %v3561_v35  ;;  %1399 = vmatpush1.msra.mxu0 %v3160_v54  ;;  %v4501_v54 = vld [vmem:[#allocation25_spill] sm:$0xff] }
 0x3f1   :  { %1329 = vmatprep.subr.mxu1 %v3568_v39  ;;  %1400 = vmatprep.subr.mxu0 %v3167_v61  ;;  %v4502_v61 = vld [vmem:[#allocation8_spill] sm:$0xff] }
 0x3f2   :  { %1330 = vmatpush1.msra.mxu1 %v3575_v43  ;;  %1401 = vmatpush1.msra.mxu0 %v3173_v36  ;;  %v4503_v36 = vld [vmem:[#allocation26_spill] sm:$0xff] }
 0x3f3   :  { %1331 = vmatprep.subr.mxu1 %v3582_v47  ;;  %1402 = vmatprep.subr.mxu0 %v3179_v50  ;;  %v4504_v50 = vld [vmem:[#allocation9_spill] sm:$0xff] }
 0x3f4   :  { %1332 = vmatpush1.msra.mxu1 %v3589_v51  ;;  %1403 = vmatpush1.msra.mxu0 %v3187_v3  ;;  %v4505_v3 = vld [vmem:[#allocation27_spill] sm:$0xff] }
 0x3f5   :  { %1333 = vmatprep.subr.mxu1 %v3596_v15  ;;  %1404 = vmatprep.subr.mxu0 %v3194_v17  ;;  %v4506_v17 = vld [vmem:[#allocation10_spill] sm:$0xff] }
 0x3f6   :  { %1334 = vmatpush1.msra.mxu1 %v3603_v53  ;;  %1405 = vmatpush1.msra.mxu0 %v3200_v48  ;;  %v4507_v48 = vmov 0.0  }
 0x3f7   :  { %1335 = vmatprep.subr.mxu1 %v3610_v26  ;;  %1406 = vmatprep.subr.mxu0 %v3206_v63  ;;  %v4508_v63 = vld [vmem:[#allocation28_spill] sm:$0xff] }
 0x3f8   :  { %1336 = vmatpush1.msra.mxu1 %v3617_v56  ;;  %1407 = vmatpush1.msra.mxu0 %v3214_v5  ;;  %v4509_v5 = vld [vmem:[#allocation4_spill] sm:$0xff] }
 0x3f9   :  { %1337 = vmatprep.subr.mxu1 %v3624_v55  ;;  %1408 = vmatprep.subr.mxu0 %v4451_v14  ;;  %v4510_v14 = vld [vmem:[#allocation16_spill] sm:$0xff] }
 0x3fa   :  { %1338 = vmatpush1.msra.mxu1 %v3631_v18  ;;  %1409 = vmatpush1.msra.mxu0 %v4453_v20 }
 0x3fb   :  { %1339 = vmatprep.subr.mxu1 %v3638_v10  ;;  %1410 = vmatprep.subr.mxu0 %v4455_v24  ;;  %v4511_v24 = vld [vmem:[#allocation33_spill] sm:$0xff] }
 0x3fc   :  { %1340 = vmatpush1.msra.mxu1 %v3645_v1  ;;  %1411 = vmatpush1.msra.mxu0 %v4491_v30 }
 0x3fd   :  { %1341 = vmatprep.subr.mxu1 %v4492_v32  ;;  %1412 = vmatprep.subr.mxu0 %v4493_v38 }
 0x3fe   :  { %1342 = vmatpush1.msra.mxu1 %v4494_v44  ;;  %1413 = vmatpush1.msra.mxu0 %v4495_v19 }
 0x3ff   :  { %1343 = vmatprep.subr.mxu1 %v4496_v25  ;;  %1414 = vmatprep.subr.mxu0 %v4497_v46 }
 0x400   :  { %1344 = vmatpush1.msra.mxu1 %v4498_v52  ;;  %1415 = vmatpush1.msra.mxu0 %v4499_v23 }
 0x401   :  { %1345 = vmatprep.subr.mxu1 %v4500_v34  ;;  %1416 = vmatprep.subr.mxu0 %v4501_v54 }
 0x402   :  { %1346 = vmatpush1.msra.mxu1 %v4502_v61  ;;  %1417 = vmatpush1.msra.mxu0 %v4503_v36 }
 0x403   :  { %1347 = vmatprep.subr.mxu1 %v4504_v50  ;;  %1418 = vmatprep.subr.mxu0 %v4505_v3 }
 0x404   :  { %1348 = vmatpush1.msra.mxu1 %v4506_v17  ;;  %1381 = vmatprep.mubr.f32.mxu1 %v4507_v48 }
 0x405   :  { %1419 = vmatpush1.msra.mxu0 %v4508_v63  ;;  %1452 = vmatprep.mubr.f32.mxu0 %v4507_v48 }
 0x406   :  { %1494 = vmatprep.subr.mxu1 %v4509_v5  ;;  %1565 = vmatprep.subr.mxu0 %v4510_v14 }
 0x4a5   :  { %v1206_v20 = vpop.f32.mrf.mxu1  ;;  %v1277_v4 = vpop.f32.mrf.mxu0 }
 0x4a6   :  { %v1282_v29 = vadd.f32 %v1206_v20, %v4511_v24  ;;  %v1284_v59 = vadd.f32 %v1277_v4, %v4513_v45  ;;  %v3803_v24 = vld [vmem:[%s4282_s7 + $0x1f0] sm:$0xff]  ;;  %v3866_v45 = vld [vmem:[%s4282_s7 + $0x158] sm:$0xff] }
 0x4a7   :  { %v1208_v28 = vpop.f32.mrf.mxu1  ;;  %v1279_v0 = vpop.f32.mrf.mxu0  ;;  %v3859_v4 = vld [vmem:[%s4282_s7 + $0x170] sm:$0xff] }
 0x4a8   :  { %v2197_v2 = vmul.f32 -1.442695, %v1282_v29  ;;  %v1283_v58 = vadd.f32 %v1208_v28, %v4512_v60  ;;  %v2199_v37 = vmul.f32 -1.442695, %v1284_v59  ;;  %v1285_v41 = vadd.f32 %v1279_v0, %v4514_v42  ;;  %v3817_v29 = vld [vmem:[%s4282_s7 + $0x1d0] sm:$0xff]  ;;  %v3824_v28 = vld [vmem:[%s4282_s7 + $0x1b8] sm:$0xff] }
 0x4a9   :  { %v3838_v60 = vld [vmem:[%s4282_s7 + $0x198] sm:$0xff]  ;;  %v3873_v59 = vld [vmem:[%s4282_s7 + $0x150] sm:$0xff] }
 0x4aa   :  { %2353 = vpow2.f32 %v2197_v2  ;;  %v2198_v11 = vmul.f32 -1.442695, %v1283_v58  ;;  %v3831_v2 = vld [vmem:[%s4282_s7 + $0x1b0] sm:$0xff]  ;;  %v3880_v0 = vld [vmem:[%s4282_s7 + $0x138] sm:$0xff] }
 0x4ab   :  { %v3845_v58 = vld [vmem:[%s4282_s7 + $0x190] sm:$0xff]  ;;  %v3894_v42 = vld [vmem:[%s4282_s7 + $0x118] sm:$0xff] }
 0x4ac   :  { %2355 = vpow2.f32 %v2198_v11  ;;  %v3852_v11 = vld [vmem:[%s4282_s7 + $0x178] sm:$0xff] }
 0x4ad   :  { %2357 = vpow2.f32 %v2199_v37  ;;  %v3887_v37 = vld [vmem:[%s4282_s7 + $0x130] sm:$0xff] }
 0x4ae   :  { %2359 = vtanh.f32 %v1285_v41  ;;  %v3901_v41 = vld [vmem:[%s4282_s7 + $0x110] sm:$0xff] }
 0x4b7   :  { %v2354_v7 = vpop.eup %2353 }
 0x4b8   :  { %v1295_v9 = vadd.f32 1.0, %v2354_v7  ;;  %v3908_v7 = vld [vmem:[%s4282_s7 + $0xf8] sm:$0xff] }
 0x4b9   :  { %v2356_v13 = vpop.eup %2355 }
 0x4ba   :  { %2361 = vrcp.f32 %v1295_v9  ;;  %v1296_v8 = vadd.f32 1.0, %v2356_v13  ;;  %v2358_v30 = vpop.eup %2357  ;;  %v3915_v9 = vld [vmem:[%s4282_s7 + $0xf0] sm:$0xff]  ;;  %v3922_v13 = vld [vmem:[%s4282_s7 + $0xd8] sm:$0xff] }
 0x4bb   :  { %v2360_v38 = vpop.eup %2359  ;;  %v1297_v54 = vadd.f32 1.0, %v2358_v30  ;;  %v3936_v30 = vld [vmem:[%s4282_s7 + $0xb8] sm:$0xff] }
 0x4bc   :  { %2363 = vrcp.f32 %v1296_v8  ;;  %v3929_v8 = vld [vmem:[%s4282_s7 + $0xd0] sm:$0xff] }
 0x4bd   :  { %2365 = vrcp.f32 %v1297_v54  ;;  %v3971_v54 = vld [vmem:[%s4282_s7 + $0x70] sm:$0xff] }
 0x4be   :  { %4518 = vst [vmem:[#allocation15_spill] sm:$0xff] %v3971_v54 }
 0x4c7   :  { %v2362_v19 = vpop.eup %2361 }
 0x4c8   :  { %v1306_v46 = vmul.f32 %v2362_v19, %v2360_v38  ;;  %v3943_v38 = vld [vmem:[%s4282_s7 + $0xb0] sm:$0xff]  ;;  %v3950_v19 = vld [vmem:[%s4282_s7 + $0x98] sm:$0xff] }
 0x4c9   :  { %v2364_v23 = vpop.eup %2363 }
 0x4ca   :  { %v1305_v36 = vmul.f32 %v2364_v23, %v3714_v49  ;;  %v2366_v63 = vpop.eup %2365  ;;  %v3810_v49 = vld [vmem:[%s4282_s7 + $0x1d8] sm:$0xff] }
 0x4cb   :  { %v3964_v23 = vld [vmem:[%s4282_s7 + $0x78] sm:$0xff] }
 0x4cc   :  { %v3792_v3 = vadd.f32 %v1306_v46, %v1305_v36  ;;  %v3957_v46 = vld [vmem:[%s4282_s7 + $0x90] sm:$0xff]  ;;  %4517 = vst [vmem:[#allocation14_spill] sm:$0xff] %v3964_v23  ;;  %v3978_v36 = vld [vmem:[%s4282_s7 + $0x58] sm:$0xff] }
 0x4cd   :  { %4516 = vst [vmem:[#allocation13_spill] sm:$0xff] %v3957_v46  ;;  %4519 = vst [vmem:[#allocation29_spill] sm:$0xff] %v3978_v36 }
 0x4ce   :  { %2367 = vtanh.f32 %v3792_v3 }
 0x4db   :  { %v2368_v14 = vpop.eup %2367 }
 0x4dc   :  { %v3795_v20 = vmul.f32 %v2368_v14, %v2366_v63  ;;  %v3985_v63 = vld [vmem:[%s4282_s7 + $0x50] sm:$0xff]  ;;  %v3992_v14 = vld [vmem:[%s4282_s7 + $0x38] sm:$0xff] }
 0x4dd   :  { %4520 = vst [vmem:[#allocation30_spill] sm:$0xff] %v3985_v63  ;;  %4521 = vst [vmem:[#allocation31_spill] sm:$0xff] %v3992_v14 }
 0x4de   :  { %4515 = vst [vmem:[#allocation12_spill] sm:$0xff] %v3795_v20  ;;  %1382 = vmatmul.mubr.f32.vlgmr.msra.gmra.mxu1 %v3795_v20  ;;  %1453 = vmatmul.mubr.f32.vlgmr.msra.gmra.mxu0 %v3795_v20  ;;  %v3999_v20 = vld [vmem:[%s4282_s7 + $0x30] sm:$0xff] }
 0x4df   :  { %1495 = vmatpush1.msra.mxu1 %v3491_v40  ;;  %1566 = vmatpush1.msra.mxu0 %v3803_v24  ;;  %4522 = vst [vmem:[#allocation32_spill] sm:$0xff] %v3999_v20 }
 0x4e0   :  { %1496 = vmatprep.subr.mxu1 %v3498_v62  ;;  %1567 = vmatprep.subr.mxu0 %v3810_v49 }
 0x4e1   :  { %1497 = vmatpush1.msra.mxu1 %v3505_v57  ;;  %1568 = vmatpush1.msra.mxu0 %v3817_v29 }
 0x4e2   :  { %1498 = vmatprep.subr.mxu1 %v3512_v21  ;;  %1569 = vmatprep.subr.mxu0 %v3824_v28 }
 0x4e3   :  { %1499 = vmatpush1.msra.mxu1 %v3519_v6  ;;  %1570 = vmatpush1.msra.mxu0 %v3831_v2 }
 0x4e4   :  { %1500 = vmatprep.subr.mxu1 %v3526_v12  ;;  %1571 = vmatprep.subr.mxu0 %v3838_v60 }
 0x4e5   :  { %1501 = vmatpush1.msra.mxu1 %v3533_v16  ;;  %1572 = vmatpush1.msra.mxu0 %v3845_v58 }
 0x4e6   :  { %1502 = vmatprep.subr.mxu1 %v3540_v22  ;;  %1573 = vmatprep.subr.mxu0 %v3852_v11 }
 0x4e7   :  { %1503 = vmatpush1.msra.mxu1 %v3547_v27  ;;  %1574 = vmatpush1.msra.mxu0 %v3859_v4 }
 0x4e8   :  { %1504 = vmatprep.subr.mxu1 %v3554_v31  ;;  %1575 = vmatprep.subr.mxu0 %v3866_v45 }
 0x4e9   :  { %1505 = vmatpush1.msra.mxu1 %v3561_v35  ;;  %1576 = vmatpush1.msra.mxu0 %v3873_v59 }
 0x4ea   :  { %1506 = vmatprep.subr.mxu1 %v3568_v39  ;;  %1577 = vmatprep.subr.mxu0 %v3880_v0 }
 0x4eb   :  { %1507 = vmatpush1.msra.mxu1 %v3575_v43  ;;  %1578 = vmatpush1.msra.mxu0 %v3887_v37 }
 0x4ec   :  { %1508 = vmatprep.subr.mxu1 %v3582_v47  ;;  %1579 = vmatprep.subr.mxu0 %v3894_v42 }
 0x4ed   :  { %1509 = vmatpush1.msra.mxu1 %v3589_v51  ;;  %1580 = vmatpush1.msra.mxu0 %v3901_v41 }
 0x4ee   :  { %1510 = vmatprep.subr.mxu1 %v3596_v15  ;;  %1581 = vmatprep.subr.mxu0 %v3908_v7 }
 0x4ef   :  { %1511 = vmatpush1.msra.mxu1 %v3603_v53  ;;  %1582 = vmatpush1.msra.mxu0 %v3915_v9 }
 0x4f0   :  { %1512 = vmatprep.subr.mxu1 %v3610_v26  ;;  %1583 = vmatprep.subr.mxu0 %v3922_v13 }
 0x4f1   :  { %1513 = vmatpush1.msra.mxu1 %v3617_v56  ;;  %1584 = vmatpush1.msra.mxu0 %v3929_v8 }
 0x4f2   :  { %1514 = vmatprep.subr.mxu1 %v3624_v55  ;;  %1585 = vmatprep.subr.mxu0 %v3936_v30 }
 0x4f3   :  { %1515 = vmatpush1.msra.mxu1 %v3631_v18  ;;  %1586 = vmatpush1.msra.mxu0 %v3943_v38 }
 0x4f4   :  { %1516 = vmatprep.subr.mxu1 %v3638_v10  ;;  %1587 = vmatprep.subr.mxu0 %v3950_v19 }
 0x4f5   :  { %1517 = vmatpush1.msra.mxu1 %v3645_v1  ;;  %1588 = vmatpush1.msra.mxu0 %v3957_v46 }
 0x4f6   :  { %1518 = vmatprep.subr.mxu1 %v4492_v32  ;;  %1589 = vmatprep.subr.mxu0 %v3964_v23 }
 0x4f7   :  { %1519 = vmatpush1.msra.mxu1 %v4494_v44  ;;  %1590 = vmatpush1.msra.mxu0 %v3971_v54  ;;  %v4529_v44 = vld [vmem:[#allocation46_spill] sm:$0xff] }
 0x4f8   :  { %1520 = vmatprep.subr.mxu1 %v4496_v25  ;;  %1591 = vmatprep.subr.mxu0 %v3978_v36  ;;  %v4528_v36 = vld [vmem:[#allocation45_spill] sm:$0xff] }
 0x4f9   :  { %1521 = vmatpush1.msra.mxu1 %v4498_v52  ;;  %1592 = vmatpush1.msra.mxu0 %v3985_v63  ;;  %v4527_v63 = vld [vmem:[#allocation36_spill] sm:$0xff] }
 0x4fa   :  { %1522 = vmatprep.subr.mxu1 %v4500_v34  ;;  %1593 = vmatprep.subr.mxu0 %v3992_v14 }
 0x4fb   :  { %1523 = vmatpush1.msra.mxu1 %v4502_v61  ;;  %1594 = vmatpush1.msra.mxu0 %v3999_v20  ;;  %v4014_v61 = vld [vmem:[%s4282_s7 + $0x10] sm:$0xff] }
 0x4fc   :  { %1524 = vmatprep.subr.mxu1 %v4504_v50  ;;  %1595 = vmatprep.subr.mxu0 %v4006_v33  ;;  %4524 = vst [vmem:[#allocation21_spill] sm:$0xff] %v4014_v61  ;;  %v4022_v50 = vld [vmem:[%s4282_s7 + $0x1f8] sm:$0xff] }
 0x4fd   :  { %1525 = vmatpush1.msra.mxu1 %v4506_v17  ;;  %1558 = vmatprep.mubr.f32.mxu1 %v4507_v48  ;;  %4525 = vst [vmem:[#allocation22_spill] sm:$0xff] %v4022_v50  ;;  %v4526_v33 = vld [vmem:[#allocation35_spill] sm:$0xff] }
 0x4fe   :  { %1596 = vmatpush1.msra.mxu0 %v4014_v61  ;;  %1629 = vmatprep.mubr.f32.mxu0 %v4507_v48 }
 0x4ff   :  { %1671 = vmatprep.subr.mxu1 %v4509_v5  ;;  %1742 = vmatprep.subr.mxu0 %v4022_v50 }
 0x59e   :  { %v1383_v17 = vpop.f32.mrf.mxu1  ;;  %v1454_v48 = vpop.f32.mrf.mxu0 }
 0x59f   :  { %v1459_v20 = vadd.f32 %v1383_v17, %v4526_v33  ;;  %v1461_v5 = vadd.f32 %v1454_v48, %v4528_v36 }
 0x5a0   :  { %v1385_v14 = vpop.f32.mrf.mxu1  ;;  %v1456_v25 = vpop.f32.mrf.mxu0 }
 0x5a1   :  { %v2200_v34 = vmul.f32 -1.442695, %v1459_v20  ;;  %v1460_v52 = vadd.f32 %v1385_v14, %v4527_v63  ;;  %v2202_v54 = vmul.f32 -1.442695, %v1461_v5  ;;  %v1462_v23 = vadd.f32 %v1456_v25, %v4529_v44  ;;  %v4532_v5 = vld [vmem:[#allocation5_spill] sm:$0xff] }
 0x5a2   :  { %v4537_v14 = vld [vmem:[#allocation29_spill] sm:$0xff] }
 0x5a3   :  { %2369 = vpow2.f32 %v2200_v34  ;;  %v2201_v61 = vmul.f32 -1.442695, %v1460_v52 }
 0x5a5   :  { %2371 = vpow2.f32 %v2201_v61 }
 0x5a6   :  { %2373 = vpow2.f32 %v2202_v54  ;;  %v4536_v54 = vld [vmem:[#allocation6_spill] sm:$0xff] }
 0x5a7   :  { %2375 = vtanh.f32 %v1462_v23  ;;  %v4535_v23 = vld [vmem:[#allocation15_spill] sm:$0xff] }
 0x5b0   :  { %v2370_v32 = vpop.eup %2369 }
 0x5b1   :  { %v1472_v46 = vadd.f32 1.0, %v2370_v32 }
 0x5b2   :  { %v2372_v50 = vpop.eup %2371 }
 0x5b3   :  { %2377 = vrcp.f32 %v1472_v46  ;;  %v1473_v33 = vadd.f32 1.0, %v2372_v50  ;;  %v2374_v17 = vpop.eup %2373  ;;  %v4531_v50 = vld [vmem:[#allocation13_spill] sm:$0xff]  ;;  %v4534_v46 = vld [vmem:[#allocation18_spill] sm:$0xff] }
 0x5b4   :  { %v2376_v20 = vpop.eup %2375  ;;  %v1474_v63 = vadd.f32 1.0, %v2374_v17  ;;  %v4539_v17 = vld [vmem:[#allocation30_spill] sm:$0xff] }
 0x5b5   :  { %2379 = vrcp.f32 %v1473_v33  ;;  %v4538_v33 = vld [vmem:[#allocation19_spill] sm:$0xff] }
 0x5b6   :  { %2381 = vrcp.f32 %v1474_v63  ;;  %v4544_v63 = vld [vmem:[#allocation9_spill] sm:$0xff] }
 0x5c0   :  { %v2378_v34 = vpop.eup %2377 }
 0x5c1   :  { %v1483_v52 = vmul.f32 %v2378_v34, %v2376_v20  ;;  %v4540_v20 = vld [vmem:[#allocation7_spill] sm:$0xff] }
 0x5c2   :  { %v2380_v61 = vpop.eup %2379  ;;  %v4541_v34 = vld [vmem:[#allocation31_spill] sm:$0xff] }
 0x5c3   :  { %v1482_v48 = vmul.f32 %v2380_v61, %v3792_v3  ;;  %v2382_v32 = vpop.eup %2381  ;;  %v4533_v3 = vld [vmem:[#allocation14_spill] sm:$0xff]  ;;  %v4543_v61 = vld [vmem:[#allocation32_spill] sm:$0xff] }
 0x5c5   :  { %v4030_v36 = vadd.f32 %v1483_v52, %v1482_v48  ;;  %v4542_v52 = vld [vmem:[#allocation8_spill] sm:$0xff] }
 0x5c6   :  { %v4545_v48 = vld [vmem:[#allocation20_spill] sm:$0xff] }
 0x5c7   :  { %2383 = vtanh.f32 %v4030_v36 }
 0x5d4   :  { %v2384_v44 = vpop.eup %2383 }
 0x5d5   :  { %v4033_v25 = vmul.f32 %v2384_v44, %v2382_v32  ;;  %v4546_v32 = vld [vmem:[#allocation10_spill] sm:$0xff]  ;;  %v4547_v44 = vmov 0.0  }
 0x5d7   :  { %4530 = vst [vmem:[#allocation23_spill] sm:$0xff] %v4033_v25  ;;  %1559 = vmatmul.mubr.f32.vlgmr.msra.gmra.mxu1 %v4033_v25  ;;  %1630 = vmatmul.mubr.f32.vlgmr.msra.gmra.mxu0 %v4033_v25  ;;  %v4548_v25 = vld [vmem:[#allocation21_spill] sm:$0xff] }
 0x5d8   :  { %1672 = vmatpush1.msra.mxu1 %v3491_v40  ;;  %1743 = vmatpush1.msra.mxu0 %v3803_v24 }
 0x5d9   :  { %1673 = vmatprep.subr.mxu1 %v3498_v62  ;;  %1744 = vmatprep.subr.mxu0 %v3810_v49 }
 0x5da   :  { %1674 = vmatpush1.msra.mxu1 %v3505_v57  ;;  %1745 = vmatpush1.msra.mxu0 %v3817_v29 }
 0x5db   :  { %1675 = vmatprep.subr.mxu1 %v3512_v21  ;;  %1746 = vmatprep.subr.mxu0 %v3824_v28 }
 0x5dc   :  { %1676 = vmatpush1.msra.mxu1 %v3519_v6  ;;  %1747 = vmatpush1.msra.mxu0 %v3831_v2 }
 0x5dd   :  { %1677 = vmatprep.subr.mxu1 %v3526_v12  ;;  %1748 = vmatprep.subr.mxu0 %v3838_v60 }
 0x5de   :  { %1678 = vmatpush1.msra.mxu1 %v3533_v16  ;;  %1749 = vmatpush1.msra.mxu0 %v3845_v58 }
 0x5df   :  { %1679 = vmatprep.subr.mxu1 %v3540_v22  ;;  %1750 = vmatprep.subr.mxu0 %v3852_v11 }
 0x5e0   :  { %1680 = vmatpush1.msra.mxu1 %v3547_v27  ;;  %1751 = vmatpush1.msra.mxu0 %v3859_v4 }
 0x5e1   :  { %1681 = vmatprep.subr.mxu1 %v3554_v31  ;;  %1752 = vmatprep.subr.mxu0 %v3866_v45 }
 0x5e2   :  { %1682 = vmatpush1.msra.mxu1 %v3561_v35  ;;  %1753 = vmatpush1.msra.mxu0 %v3873_v59 }
 0x5e3   :  { %1683 = vmatprep.subr.mxu1 %v3568_v39  ;;  %1754 = vmatprep.subr.mxu0 %v3880_v0 }
 0x5e4   :  { %1684 = vmatpush1.msra.mxu1 %v3575_v43  ;;  %1755 = vmatpush1.msra.mxu0 %v3887_v37 }
 0x5e5   :  { %1685 = vmatprep.subr.mxu1 %v3582_v47  ;;  %1756 = vmatprep.subr.mxu0 %v3894_v42 }
 0x5e6   :  { %1686 = vmatpush1.msra.mxu1 %v3589_v51  ;;  %1757 = vmatpush1.msra.mxu0 %v3901_v41 }
 0x5e7   :  { %1687 = vmatprep.subr.mxu1 %v3596_v15  ;;  %1758 = vmatprep.subr.mxu0 %v3908_v7 }
 0x5e8   :  { %1688 = vmatpush1.msra.mxu1 %v3603_v53  ;;  %1759 = vmatpush1.msra.mxu0 %v3915_v9 }
 0x5e9   :  { %1689 = vmatprep.subr.mxu1 %v3610_v26  ;;  %1760 = vmatprep.subr.mxu0 %v3922_v13 }
 0x5ea   :  { %1690 = vmatpush1.msra.mxu1 %v3617_v56  ;;  %1761 = vmatpush1.msra.mxu0 %v3929_v8 }
 0x5eb   :  { %1691 = vmatprep.subr.mxu1 %v3624_v55  ;;  %1762 = vmatprep.subr.mxu0 %v3936_v30 }
 0x5ec   :  { %1692 = vmatpush1.msra.mxu1 %v3631_v18  ;;  %1763 = vmatpush1.msra.mxu0 %v3943_v38 }
 0x5ed   :  { %1693 = vmatprep.subr.mxu1 %v3638_v10  ;;  %1764 = vmatprep.subr.mxu0 %v3950_v19 }
 0x5ee   :  { %1694 = vmatpush1.msra.mxu1 %v3645_v1  ;;  %1765 = vmatpush1.msra.mxu0 %v4531_v50 }
 0x5ef   :  { %1695 = vmatprep.subr.mxu1 %v4532_v5  ;;  %1766 = vmatprep.subr.mxu0 %v4533_v3 }
 0x5f0   :  { %1696 = vmatpush1.msra.mxu1 %v4534_v46  ;;  %1767 = vmatpush1.msra.mxu0 %v4535_v23  ;;  %v4553_v23 = vld [vmem:[#allocation47_spill] sm:$0xff] }
 0x5f1   :  { %1697 = vmatprep.subr.mxu1 %v4536_v54  ;;  %1768 = vmatprep.subr.mxu0 %v4537_v14 }
 0x5f2   :  { %1698 = vmatpush1.msra.mxu1 %v4538_v33  ;;  %1769 = vmatpush1.msra.mxu0 %v4539_v17  ;;  %v4549_v17 = vld [vmem:[#allocation4_spill] sm:$0xff] }
 0x5f3   :  { %1699 = vmatprep.subr.mxu1 %v4540_v20  ;;  %1770 = vmatprep.subr.mxu0 %v4541_v34  ;;  %v4550_v20 = vld [vmem:[#allocation22_spill] sm:$0xff] }
 0x5f4   :  { %1700 = vmatpush1.msra.mxu1 %v4542_v52  ;;  %1771 = vmatpush1.msra.mxu0 %v4543_v61  ;;  %v4551_v52 = vld [vmem:[#allocation37_spill] sm:$0xff] }
 0x5f5   :  { %1701 = vmatprep.subr.mxu1 %v4544_v63  ;;  %1772 = vmatprep.subr.mxu0 %v4545_v48  ;;  %v4552_v63 = vld [vmem:[#allocation38_spill] sm:$0xff] }
 0x5f6   :  { %1702 = vmatpush1.msra.mxu1 %v4546_v32  ;;  %1735 = vmatprep.mubr.f32.mxu1 %v4547_v44 }
 0x5f7   :  { %1773 = vmatpush1.msra.mxu0 %v4548_v25  ;;  %1806 = vmatprep.mubr.f32.mxu0 %v4547_v44  ;;  %v4554_v44 = vld [vmem:[#allocation48_spill] sm:$0xff] }
 0x5f8   :  { %1848 = vmatprep.subr.mxu1 %v4549_v17  ;;  %1919 = vmatprep.subr.mxu0 %v4550_v20 }
 0x697   :  { %v1560_v34 = vpop.f32.mrf.mxu1  ;;  %v1631_v32 = vpop.f32.mrf.mxu0 }
 0x698   :  { %v1636_v33 = vadd.f32 %v1560_v34, %v4551_v52  ;;  %v1638_v46 = vadd.f32 %v1631_v32, %v4553_v23 }
 0x699   :  { %v1562_v61 = vpop.f32.mrf.mxu1  ;;  %v1633_v25 = vpop.f32.mrf.mxu0 }
 0x69a   :  { %v2203_v14 = vmul.f32 -1.442695, %v1636_v33  ;;  %v1637_v54 = vadd.f32 %v1562_v61, %v4552_v63  ;;  %v2205_v3 = vmul.f32 -1.442695, %v1638_v46  ;;  %v1639_v5 = vadd.f32 %v1633_v25, %v4554_v44  ;;  %v2042_v44 = vld [vmem:[%s4287_s8 + $0x70] sm:$0xff] }
 0x69c   :  { %2385 = vpow2.f32 %v2203_v14  ;;  %v2204_v48 = vmul.f32 -1.442695, %v1637_v54 }
 0x69e   :  { %2387 = vpow2.f32 %v2204_v48 }
 0x69f   :  { %2389 = vpow2.f32 %v2205_v3 }
 0x6a0   :  { %2391 = vtanh.f32 %v1639_v5 }
 0x6a9   :  { %v2386_v17 = vpop.eup %2385 }
 0x6aa   :  { %v1649_v50 = vadd.f32 1.0, %v2386_v17  ;;  %v4577_v17 = vld [vmem:[#allocation53_spill] sm:$0xff] }
 0x6ab   :  { %v2388_v20 = vpop.eup %2387 }
 0x6ac   :  { %2393 = vrcp.f32 %v1649_v50  ;;  %v1650_v34 = vadd.f32 1.0, %v2388_v20  ;;  %v2390_v33 = vpop.eup %2389  ;;  %v2041_v20 = vld [vmem:[%s4287_s8 + $0x68] sm:$0xff] }
 0x6ad   :  { %v2392_v52 = vpop.eup %2391  ;;  %v1651_v63 = vadd.f32 1.0, %v2390_v33  ;;  %v2039_v33 = vld [vmem:[%s4287_s8 + $0x58] sm:$0xff] }
 0x6ae   :  { %2395 = vrcp.f32 %v1650_v34  ;;  %v2040_v34 = vld [vmem:[%s4287_s8 + $0x60] sm:$0xff] }
 0x6af   :  { %2397 = vrcp.f32 %v1651_v63  ;;  %v2034_v63 = vld [vmem:[%s4287_s8 + $0x30] sm:$0xff] }
 0x6b9   :  { %v2394_v14 = vpop.eup %2393 }
 0x6ba   :  { %v1660_v54 = vmul.f32 %v2394_v14, %v2392_v52  ;;  %v2038_v52 = vld [vmem:[%s4287_s8 + $0x50] sm:$0xff]  ;;  %v2037_v14 = vld [vmem:[%s4287_s8 + $0x48] sm:$0xff] }
 0x6bb   :  { %v2396_v61 = vpop.eup %2395 }
 0x6bc   :  { %v1659_v23 = vmul.f32 %v2396_v61, %v4030_v36  ;;  %v2398_v25 = vpop.eup %2397  ;;  %v2035_v61 = vld [vmem:[%s4287_s8 + $0x38] sm:$0xff] }
 0x6be   :  { %v4108_v48 = vadd.f32 %v1660_v54, %v1659_v23  ;;  %v2036_v54 = vld [vmem:[%s4287_s8 + $0x40] sm:$0xff]  ;;  %v2033_v23 = vld [vmem:[%s4287_s8 + $0x28] sm:$0xff] }
 0x6c0   :  { %2399 = vtanh.f32 %v4108_v48 }
 0x6cd   :  { %v2400_v3 = vpop.eup %2399 }
 0x6ce   :  { %v4111_v46 = vmul.f32 %v2400_v3, %v2398_v25  ;;  %v2031_v25 = vld [vmem:[%s4287_s8 + $0x18] sm:$0xff]  ;;  %v2030_v3 = vld [vmem:[%s4287_s8 + $0x10] sm:$0xff] }
 0x6d0   :  { %1736 = vmatmul.mubr.f32.vlgmr.msra.gmra.mxu1 %v4111_v46  ;;  %1807 = vmatmul.mubr.f32.vlgmr.msra.gmra.mxu0 %v4111_v46 }
 0x6d1   :  { %1849 = vmatpush1.msra.mxu1 %v3491_v40  ;;  %1920 = vmatpush1.msra.mxu0 %v3803_v24  ;;  %v4555_v40 = vld [vmem:[#allocation13_spill] sm:$0xff] }
 0x6d2   :  { %1850 = vmatprep.subr.mxu1 %v3498_v62  ;;  %1921 = vmatprep.subr.mxu0 %v3810_v49  ;;  %v4556_v62 = vld [vmem:[#allocation5_spill] sm:$0xff]  ;;  %v4574_v49 = vld [vmem:[#allocation40_spill] sm:$0xff] }
 0x6d3   :  { %1851 = vmatpush1.msra.mxu1 %v3505_v57  ;;  %1922 = vmatpush1.msra.mxu0 %v3817_v29  ;;  %v4557_v57 = vld [vmem:[#allocation14_spill] sm:$0xff] }
 0x6d4   :  { %1852 = vmatprep.subr.mxu1 %v3512_v21  ;;  %1923 = vmatprep.subr.mxu0 %v3824_v28  ;;  %v4558_v21 = vld [vmem:[#allocation18_spill] sm:$0xff] }
 0x6d5   :  { %1853 = vmatpush1.msra.mxu1 %v3519_v6  ;;  %1924 = vmatpush1.msra.mxu0 %v3831_v2  ;;  %v4559_v6 = vld [vmem:[#allocation15_spill] sm:$0xff] }
 0x6d6   :  { %1854 = vmatprep.subr.mxu1 %v3526_v12  ;;  %1925 = vmatprep.subr.mxu0 %v3838_v60  ;;  %v4560_v12 = vld [vmem:[#allocation6_spill] sm:$0xff]  ;;  %v4575_v60 = vld [vmem:[#allocation49_spill] sm:$0xff] }
 0x6d7   :  { %1855 = vmatpush1.msra.mxu1 %v3533_v16  ;;  %1926 = vmatpush1.msra.mxu0 %v3845_v58  ;;  %v4561_v16 = vld [vmem:[#allocation29_spill] sm:$0xff] }
 0x6d8   :  { %1856 = vmatprep.subr.mxu1 %v3540_v22  ;;  %1927 = vmatprep.subr.mxu0 %v3852_v11  ;;  %v4562_v22 = vld [vmem:[#allocation19_spill] sm:$0xff] }
 0x6d9   :  { %1857 = vmatpush1.msra.mxu1 %v3547_v27  ;;  %1928 = vmatpush1.msra.mxu0 %v3859_v4  ;;  %v4563_v27 = vld [vmem:[#allocation30_spill] sm:$0xff] }
 0x6da   :  { %1858 = vmatprep.subr.mxu1 %v3554_v31  ;;  %1929 = vmatprep.subr.mxu0 %v3866_v45  ;;  %v4564_v31 = vld [vmem:[#allocation7_spill] sm:$0xff]  ;;  %v4576_v45 = vld [vmem:[#allocation50_spill] sm:$0xff] }
 0x6db   :  { %1859 = vmatpush1.msra.mxu1 %v3561_v35  ;;  %1930 = vmatpush1.msra.mxu0 %v3873_v59  ;;  %v4566_v35 = vld [vmem:[#allocation8_spill] sm:$0xff] }
 0x6dc   :  { %1860 = vmatprep.subr.mxu1 %v3568_v39  ;;  %1931 = vmatprep.subr.mxu0 %v3880_v0  ;;  %v4567_v39 = vld [vmem:[#allocation32_spill] sm:$0xff] }
 0x6dd   :  { %1861 = vmatpush1.msra.mxu1 %v3575_v43  ;;  %1932 = vmatpush1.msra.mxu0 %v3887_v37  ;;  %v4568_v43 = vld [vmem:[#allocation9_spill] sm:$0xff] }
 0x6de   :  { %1862 = vmatprep.subr.mxu1 %v3582_v47  ;;  %1933 = vmatprep.subr.mxu0 %v3894_v42  ;;  %v4569_v47 = vld [vmem:[#allocation20_spill] sm:$0xff] }
 0x6df   :  { %1863 = vmatpush1.msra.mxu1 %v3589_v51  ;;  %1934 = vmatpush1.msra.mxu0 %v3901_v41  ;;  %v4570_v51 = vld [vmem:[#allocation10_spill] sm:$0xff] }
 0x6e0   :  { %1864 = vmatprep.subr.mxu1 %v3596_v15  ;;  %1935 = vmatprep.subr.mxu0 %v3908_v7  ;;  %v4571_v15 = vmov 0.0  }
 0x6e1   :  { %1865 = vmatpush1.msra.mxu1 %v3603_v53  ;;  %1936 = vmatpush1.msra.mxu0 %v3915_v9  ;;  %v4572_v53 = vld [vmem:[#allocation21_spill] sm:$0xff] }
 0x6e2   :  { %1866 = vmatprep.subr.mxu1 %v3610_v26  ;;  %1937 = vmatprep.subr.mxu0 %v3922_v13  ;;  %v2043_v26 = vld [vmem:[%s4287_s8 + $0x78] sm:$0xff] }
 0x6e3   :  { %1867 = vmatpush1.msra.mxu1 %v3617_v56  ;;  %1938 = vmatpush1.msra.mxu0 %v3929_v8 }
 0x6e4   :  { %1868 = vmatprep.subr.mxu1 %v3624_v55  ;;  %1939 = vmatprep.subr.mxu0 %v3936_v30  ;;  %v4573_v55 = vld [vmem:[#allocation39_spill] sm:$0xff] }
 0x6e5   :  { %1869 = vmatpush1.msra.mxu1 %v3631_v18  ;;  %1940 = vmatpush1.msra.mxu0 %v3943_v38 }
 0x6e6   :  { %1870 = vmatprep.subr.mxu1 %v3638_v10  ;;  %1941 = vmatprep.subr.mxu0 %v3950_v19 }
 0x6e7   :  { %1871 = vmatpush1.msra.mxu1 %v3645_v1  ;;  %1942 = vmatpush1.msra.mxu0 %v4555_v40  ;;  %v4565_v1 = vld [vmem:[#allocation31_spill] sm:$0xff]  ;;  %v2029_v40 = vld [vmem:[%s4287_s8 + $0x8] sm:$0xff] }
 0x6e8   :  { %1872 = vmatprep.subr.mxu1 %v4556_v62  ;;  %1943 = vmatprep.subr.mxu0 %v4557_v57  ;;  %v2028_v62 = vld [vmem:[%s4287_s8] sm:$0xff]  ;;  %v4578_v57 = vld [vmem:[#allocation17_spill] sm:$0xff] }
 0x6e9   :  { %1873 = vmatpush1.msra.mxu1 %v4558_v21  ;;  %1944 = vmatpush1.msra.mxu0 %v4559_v6  ;;  %v4579_v21 = vld [vmem:[#allocation11_spill] sm:$0xff]  ;;  %v4580_v6 = vld [vmem:[#allocation12_spill] sm:$0xff] }
 0x6ea   :  { %1874 = vmatprep.subr.mxu1 %v4560_v12  ;;  %1945 = vmatprep.subr.mxu0 %v4561_v16  ;;  %v4581_v12 = vld [vmem:[#allocation23_spill] sm:$0xff] }
 0x6eb   :  { %1875 = vmatpush1.msra.mxu1 %v4562_v22  ;;  %1946 = vmatpush1.msra.mxu0 %v4563_v27  ;;  %v4582_v22 = vld [vmem:[#allocation41_spill] sm:$0xff] }
 0x6ec   :  { %1876 = vmatprep.subr.mxu1 %v4564_v31  ;;  %1947 = vmatprep.subr.mxu0 %v4565_v1 }
 0x6ed   :  { %1877 = vmatpush1.msra.mxu1 %v4566_v35  ;;  %1948 = vmatpush1.msra.mxu0 %v4567_v39  ;;  %v4583_v35 = vld [vmem:[#allocation42_spill] sm:$0xff] }
 0x6ee   :  { %1878 = vmatprep.subr.mxu1 %v4568_v43  ;;  %1949 = vmatprep.subr.mxu0 %v4569_v47 }
 0x6ef   :  { %1879 = vmatpush1.msra.mxu1 %v4570_v51  ;;  %1912 = vmatprep.mubr.f32.mxu1 %v4571_v15  ;;  %v4584_v51 = vld [vmem:[#allocation51_spill] sm:$0xff] }
 0x6f0   :  { %1950 = vmatpush1.msra.mxu0 %v4572_v53  ;;  %1983 = vmatprep.mubr.f32.mxu0 %v4571_v15 }
 0x6f1   :  { %2260 = vmatprep.subr.mxu1 %v2043_v26 }
 0x790   :  { %v1737_v56 = vpop.f32.mrf.mxu1  ;;  %v1808_v2 = vpop.f32.mrf.mxu0 }
 0x791   :  { %v1813_v18 = vadd.f32 %v1737_v56, %v4573_v55  ;;  %v1815_v58 = vadd.f32 %v1808_v2, %v4575_v60  ;;  %v4585_v56 = vld [vmem:[#allocation52_spill] sm:$0xff] }
 0x792   :  { %v1739_v10 = vpop.f32.mrf.mxu1  ;;  %v1810_v11 = vpop.f32.mrf.mxu0 }
 0x793   :  { %v2206_v24 = vmul.f32 -1.442695, %v1813_v18  ;;  %v1814_v29 = vadd.f32 %v1739_v10, %v4574_v49  ;;  %v2208_v4 = vmul.f32 -1.442695, %v1815_v58  ;;  %v1816_v59 = vadd.f32 %v1810_v11, %v4576_v45  ;;  %v2212_v49 = vld [vmem:[%s4288_s9] ss:$0 sm:$0xff] }
 0x795   :  { %2401 = vpow2.f32 %v2206_v24  ;;  %v2207_v28 = vmul.f32 -1.442695, %v1814_v29 }
 0x797   :  { %2403 = vpow2.f32 %v2207_v28 }
 0x798   :  { %2405 = vpow2.f32 %v2208_v4 }
 0x799   :  { %2407 = vtanh.f32 %v1816_v59 }
 0x7a2   :  { %v2402_v0 = vpop.eup %2401 }
 0x7a3   :  { %v1826_v37 = vadd.f32 1.0, %v2402_v0 }
 0x7a4   :  { %v2404_v42 = vpop.eup %2403 }
 0x7a5   :  { %2409 = vrcp.f32 %v1826_v37  ;;  %v1827_v41 = vadd.f32 1.0, %v2404_v42  ;;  %v2406_v7 = vpop.eup %2405 }
 0x7a6   :  { %v2408_v9 = vpop.eup %2407  ;;  %v1828_v38 = vadd.f32 1.0, %v2406_v7 }
 0x7a7   :  { %2411 = vrcp.f32 %v1827_v41 }
 0x7a8   :  { %2413 = vrcp.f32 %v1828_v38 }
 0x7b2   :  { %v2410_v13 = vpop.eup %2409 }
 0x7b3   :  { %v1837_v8 = vmul.f32 %v2410_v13, %v2408_v9 }
 0x7b4   :  { %v2412_v30 = vpop.eup %2411 }
 0x7b5   :  { %v1836_v19 = vmul.f32 %v2412_v30, %v4108_v48  ;;  %v2414_v50 = vpop.eup %2413  ;;  %v2032_v48 = vld [vmem:[%s4287_s8 + $0x20] sm:$0xff] }
 0x7b7   :  { %v4187_v36 = vadd.f32 %v1837_v8, %v1836_v19 }
 0x7b9   :  { %2415 = vtanh.f32 %v4187_v36 }
 0x7c6   :  { %v2416_v5 = vpop.eup %2415 }
 0x7c7   :  { %v1840_v32 = vmul.f32 %v2416_v5, %v2414_v50 }
 0x7c9   :  { %1913 = vmatmul.mubr.f32.vlgmr.msra.gmra.mxu1 %v1840_v32  ;;  %1984 = vmatmul.mubr.f32.vlgmr.msra.gmra.mxu0 %v1840_v32 }
 0x7ca   :  { %2261 = vmatpush3.msra.mxu1 %v2043_v26  ;;  %2292 = vmatprep.mubr.f32.mxu1 %v4577_v17 }
 0x7cb   :  { %2262 = vmatprep.subr.mxu1 %v2042_v44 }
 0x7cc   :  { %2263 = vmatpush3.msra.mxu1 %v2042_v44 }
 0x7cd   :  { %2264 = vmatprep.subr.mxu1 %v2041_v20 }
 0x7ce   :  { %2265 = vmatpush3.msra.mxu1 %v2041_v20 }
 0x7cf   :  { %2266 = vmatprep.subr.mxu1 %v2040_v34 }
 0x7d0   :  { %2267 = vmatpush3.msra.mxu1 %v2040_v34 }
 0x7d1   :  { %2268 = vmatprep.subr.mxu1 %v2039_v33 }
 0x7d2   :  { %2269 = vmatpush3.msra.mxu1 %v2039_v33 }
 0x7d3   :  { %2270 = vmatprep.subr.mxu1 %v2038_v52 }
 0x7d4   :  { %2271 = vmatpush3.msra.mxu1 %v2038_v52 }
 0x7d5   :  { %2272 = vmatprep.subr.mxu1 %v2037_v14 }
 0x7d6   :  { %2273 = vmatpush3.msra.mxu1 %v2037_v14 }
 0x7d7   :  { %2274 = vmatprep.subr.mxu1 %v2036_v54 }
 0x7d8   :  { %2275 = vmatpush3.msra.mxu1 %v2036_v54 }
 0x7d9   :  { %2276 = vmatprep.subr.mxu1 %v2035_v61 }
 0x7da   :  { %2277 = vmatpush3.msra.mxu1 %v2035_v61 }
 0x7db   :  { %2278 = vmatprep.subr.mxu1 %v2034_v63 }
 0x7dc   :  { %2279 = vmatpush3.msra.mxu1 %v2034_v63 }
 0x7dd   :  { %2280 = vmatprep.subr.mxu1 %v2033_v23 }
 0x7de   :  { %2281 = vmatpush3.msra.mxu1 %v2033_v23 }
 0x7df   :  { %2282 = vmatprep.subr.mxu1 %v2032_v48 }
 0x7e0   :  { %2283 = vmatpush3.msra.mxu1 %v2032_v48 }
 0x7e1   :  { %2284 = vmatprep.subr.mxu1 %v2031_v25 }
 0x7e2   :  { %2285 = vmatpush3.msra.mxu1 %v2031_v25 }
 0x7e3   :  { %2286 = vmatprep.subr.mxu1 %v2030_v3 }
 0x7e4   :  { %2287 = vmatpush3.msra.mxu1 %v2030_v3 }
 0x7e5   :  { %2288 = vmatprep.subr.mxu1 %v2029_v40 }
 0x7e6   :  { %2289 = vmatpush3.msra.mxu1 %v2029_v40 }
 0x7e7   :  { %2290 = vmatprep.subr.mxu1 %v2028_v62 }
 0x7e8   :  { %2291 = vmatpush3.msra.mxu1 %v2028_v62 }
 0x7e9   :  { %2293 = vmatmul.mubr.f32.vlgmr.msra.gmra.mxu1 %v4578_v57 }
 0x7ea   :  { %2295 = vmatprep.mubr.f32.mxu1 %v4579_v21 }
 0x7ed   :  { %2296 = vmatmul.mubr.f32.gmra.mxu1 %v4580_v6 }
 0x7ee   :  { %2298 = vmatprep.mubr.f32.mxu1 %v4581_v12 }
 0x7f1   :  { %2299 = vmatmul.mubr.f32.gmra.mxu1 %v4111_v46 }
 0x7f2   :  { %2301 = vmatprep.mubr.f32.mxu1 %v1840_v32 }
 0x889   :  { %v1914_v16 = vpop.f32.mrf.mxu1  ;;  %v1985_v47 = vpop.f32.mrf.mxu0 }
 0x88a   :  { %v1990_v27 = vadd.f32 %v1914_v16, %v4582_v22  ;;  %v1992_v15 = vadd.f32 %v1985_v47, %v4584_v51 }
 0x88b   :  { %v1916_v31 = vpop.f32.mrf.mxu1  ;;  %v1987_v53 = vpop.f32.mrf.mxu0 }
 0x88c   :  { %v2209_v1 = vmul.f32 -1.442695, %v1990_v27  ;;  %v1991_v39 = vadd.f32 %v1916_v31, %v4583_v35  ;;  %v2211_v26 = vmul.f32 -1.442695, %v1992_v15  ;;  %v1993_v55 = vadd.f32 %v1987_v53, %v4585_v56 }
 0x88e   :  { %2417 = vpow2.f32 %v2209_v1  ;;  %v2210_v43 = vmul.f32 -1.442695, %v1991_v39 }
 0x890   :  { %2419 = vpow2.f32 %v2210_v43 }
 0x891   :  { %2421 = vpow2.f32 %v2211_v26 }
 0x892   :  { %2423 = vtanh.f32 %v1993_v55 }
 0x89b   :  { %v2418_v18 = vpop.eup %2417 }
 0x89c   :  { %v2003_v46 = vadd.f32 1.0, %v2418_v18 }
 0x89d   :  { %v2420_v10 = vpop.eup %2419 }
 0x89e   :  { %2425 = vrcp.f32 %v2003_v46  ;;  %v2004_v24 = vadd.f32 1.0, %v2420_v10  ;;  %v2422_v29 = vpop.eup %2421 }
 0x89f   :  { %v2424_v2 = vpop.eup %2423  ;;  %v2005_v0 = vadd.f32 1.0, %v2422_v29 }
 0x8a0   :  { %2427 = vrcp.f32 %v2004_v24 }
 0x8a1   :  { %2429 = vrcp.f32 %v2005_v0 }
 0x8a9   :  { %v2294_v28 = vpop.f32.mrf.mxu1 }
 0x8aa   :  { %v2123_v60 = vadd.f32 %v2294_v28, %v2212_v49 }
 0x8ab   :  { %v2426_v58 = vpop.eup %2425  ;;  %v2117_v11 = vpop.f32.mrf.mxu1 }
 0x8ac   :  { %v2014_v4 = vmul.f32 %v2426_v58, %v2424_v2  ;;  %2157 = vst [vmem:[%s4289_s10 + $0x8] sm:$0xff] %v2123_v60  ;;  %v2118_v45 = vadd.f32 %v2212_v49, %v2117_v11 }
 0x8ad   :  { %v2428_v59 = vpop.eup %2427  ;;  %v2297_v37 = vpop.f32.mrf.mxu1 }
 0x8ae   :  { %v2013_v42 = vmul.f32 %v2428_v59, %v4187_v36  ;;  %2156 = vst [vmem:[%s4289_s10] sm:$0xff] %v2118_v45  ;;  %v2133_v41 = vadd.f32 %v2297_v37, %v2212_v49  ;;  %v2430_v36 = vpop.eup %2429 }
 0x8af   :  { %v2127_v7 = vpop.f32.mrf.mxu1 }
 0x8b0   :  { %v2015_v9 = vadd.f32 %v2014_v4, %v2013_v42  ;;  %2159 = vst [vmem:[%s4289_s10 + $0x18] sm:$0xff] %v2133_v41  ;;  %v2128_v13 = vadd.f32 %v2212_v49, %v2127_v7 }
 0x8b1   :  { %v2300_v8 = vpop.f32.mrf.mxu1 }
 0x8b2   :  { %2165 = vst [vmem:[%s4290_s12] sm:$0xff] %v2015_v9  ;;  %2158 = vst [vmem:[%s4289_s10 + $0x10] sm:$0xff] %v2128_v13  ;;  %v2143_v30 = vadd.f32 %v2300_v8, %v2212_v49  ;;  %2431 = vtanh.f32 %v2015_v9 }
 0x8b3   :  { %v2137_v38 = vpop.f32.mrf.mxu1 }
 0x8b4   :  { %2161 = vst [vmem:[%s4289_s10 + $0x28] sm:$0xff] %v2143_v30  ;;  %v2138_v19 = vadd.f32 %v2212_v49, %v2137_v38 }
 0x8b6   :  { %2160 = vst [vmem:[%s4289_s10 + $0x20] sm:$0xff] %v2138_v19 }
 0x8bf   :  { %v2432_v50 = vpop.eup %2431 }
 0x8c0   :  { %v2017_v5 = vmul.f32 %v2432_v50, %v2430_v36 }
 0x8c2   :  { %2302 = vmatmul.mubr.f32.gmra.mxu1 %v2017_v5  ;;  %2164 = vst [vmem:[%s4291_s11] sm:$0xff] %v2017_v5 }
 0x982   :  { %v2303_v32 = vpop.f32.mrf.mxu1 }
 0x983   :  { %v2153_v44 = vadd.f32 %v2303_v32, %v2212_v49 }
 0x984   :  { %v2147_v17 = vpop.f32.mrf.mxu1 }
 0x985   :  { %2163 = vst [vmem:[%s4289_s10 + $0x38] sm:$0xff] %v2153_v44  ;;  %v2148_v20 = vadd.f32 %v2212_v49, %v2147_v17 }
 0x987   :  { %2162 = vst [vmem:[%s4289_s10 + $0x30] sm:$0xff] %v2148_v20 }

</bundles_post_ra>
